<compile_context>
chip_gen: v7x
topology: tpu7x:2x2x1
jax: 0.10.0
libtpu: 0.0.40
codegen_flags: <defaults>
</compile_context>

<pallas_src>
import functools

import jax
import jax.numpy as jnp
from jax.experimental import pallas as pl
from jax.experimental.pallas import tpu as pltpu

_LANE = 128


# ---------------------------------------------------------------------------
# Generation-aware VMEM budgeting
# ---------------------------------------------------------------------------
def _tpu_vmem_capacity_bytes() -> int:
    """Physical VMEM per TensorCore; conservative v7x fallback if unknown."""
    try:
        cap = int(pltpu.get_tpu_info().vmem_capacity_bytes)
        if cap > 0:
            return cap
    except Exception:
        pass
    return 64 * 1024 * 1024  # v7x per-TC (most constrained) — safe everywhere


def _weight_budget_bytes(vmem_cap: int) -> int:
    # Double-buffered bf16 weight tiles get ~3/8 of VMEM:
    #   v7x (64 MiB)  -> 24 MiB ; v5e/v6e (128 MiB) -> 48 MiB.
    return (vmem_cap * 3) // 8


def _safe_vmem_cap(vmem_cap: int) -> int:
    # Leave headroom for compiler-internal scratch; never ask for >100 MiB.
    return min(100 << 20, (vmem_cap * 7) // 8)


def _vmem_estimate_bytes(tm: int, tk: int, dim: int, weight_buffers: int = 2) -> int:
    w13 = weight_buffers * dim * (2 * tk) * 2          # bf16 [w1|w3] tiles
    w2 = weight_buffers * tk * dim * 2                 # bf16 down-proj tiles
    xin = 2 * tm * dim * 2                             # x tiles (double-buffered)
    out = 2 * tm * dim * 4                             # output tiles (<= f32)
    acc = tm * dim * 4                                 # f32 accumulator scratch
    tmp = tm * (2 * tk) * 4 + tm * tk * 2 + tm * dim * 4   # h, gated, partial
    return int((w13 + w2 + xin + out + acc + tmp) * 1.2) + (2 << 20)


# ---------------------------------------------------------------------------
# Tiling heuristics
# ---------------------------------------------------------------------------
def _choose_tk(dim: int, inter_dim: int, weight_budget: int) -> int:
    """Largest multiple of 128 dividing inter_dim whose double-buffered bf16
    weight tiles fit the (generation-aware) weight budget."""
    # per-k weight bytes = (dim*2*tk + tk*dim)*2B = 6*dim*tk; x2 double buffering.
    cap = weight_budget // (12 * dim)
    if inter_dim <= _LANE or inter_dim <= cap:
        return inter_dim  # whole inter fits comfortably -> no reduction tiling
    best = None
    tk = _LANE
    while tk <= min(cap, inter_dim):
        if inter_dim % tk == 0:
            best = tk
        tk += _LANE
    return best if best is not None else inter_dim


def _choose_tm(batch: int, dim: int, tk: int, safe_cap: int) -> int:
    """Batch tile: as large as fits VMEM (weights are re-streamed per batch
    tile, so bigger TM directly cuts weight HBM traffic for prefill)."""
    for cand in (512, 256, 128, 64, 32, 16, 8):
        if batch % cand == 0 and _vmem_estimate_bytes(cand, tk, dim) <= safe_cap:
            return cand
    return batch  # tiny / odd batch: one full-extent block (always legal)


# ---------------------------------------------------------------------------
# Kernel
# ---------------------------------------------------------------------------
def _mlp_kernel(x_ref, w13_ref, w2_ref, o_ref, acc_ref, *, tk):
    """One (split, batch-tile, inter-tile) grid step.

    x_ref  : (TM, dim)        bf16   resident across the reduction axis
    w13_ref: (1, dim, 2*TK)   bf16   [w1 tile | w3 tile], contiguous, streamed
    w2_ref : (TK, dim)        bf16   down-proj tile, streamed
    o_ref  : (1, TM, dim)            written at the last k-step
    acc_ref: (TM, dim)        f32    scratch accumulator
    """
    k = pl.program_id(2)

    @pl.when(k == 0)
    def _():
        acc_ref[...] = jnp.zeros_like(acc_ref)

    x = x_ref[...]
    # Fused gate + up projection: one MXU matmul, f32 accumulation.
    h = jnp.dot(x, w13_ref[0], preferred_element_type=jnp.float32)  # (TM, 2*TK)
    h1 = h[:, :tk]
    h3 = h[:, tk:]
    # SiLU(h1) * h3 on the VPU/EUP, cast to bf16 (matches the torch bf16 path).
    gated = (h1 * jax.nn.sigmoid(h1) * h3).astype(x_ref.dtype)
    # Partial down projection for this inter_dim slice, accumulated in f32.
    acc_ref[...] += jnp.dot(gated, w2_ref[...], preferred_element_type=jnp.float32)

    @pl.when(k == pl.num_programs(2) - 1)
    def _():
        o_ref[0] = acc_ref[...].astype(o_ref.dtype)


# ---------------------------------------------------------------------------
# Wrappers
# ---------------------------------------------------------------------------
def prepare_mlp_weights(w1, w2, w3, *, tk):
    """One-time (model-load) weight prep — keep OUT of the per-token hot path.

    Returns:
      w13: (nk, dim, 2*tk) bf16 — per inter-tile contiguous slab [w1.T | w3.T]
      w2t: (inter_dim, dim) bf16
    """
    inter_dim, dim = w1.shape
    assert inter_dim % tk == 0, "inter_dim must be divisible by the inter tile"
    nk = inter_dim // tk
    w1t = w1.T.reshape(dim, nk, tk).transpose(1, 0, 2)   # (nk, dim, tk)
    w3t = w3.T.reshape(dim, nk, tk).transpose(1, 0, 2)   # (nk, dim, tk)
    w13 = jnp.concatenate([w1t, w3t], axis=2)            # (nk, dim, 2*tk), contiguous per k
    return w13, w2.T


def mlp_pallas_prepared(x, w13, w2t, *, tm, tk, num_reduction_splits=1):
    """Hot path: x (B, dim) bf16 with pre-prepared weights.

    num_reduction_splits > 1 shards the inter_dim reduction across a leading
    'parallel' grid axis (use 2 on v7x for decode / B//tm == 1 so both
    TensorCores stream weights); partial f32 outputs are summed here.
    """
    B, dim = x.shape
    inter_dim = w2t.shape[0]
    nk = inter_dim // tk
    ns = num_reduction_splits
    assert w13.shape == (nk, dim, 2 * tk)
    assert w2t.shape == (inter_dim, dim)
    assert B % tm == 0, "batch must be divisible by the batch tile"
    assert nk % ns == 0, "inter tiles must be divisible by num_reduction_splits"
    nk_s = nk // ns

    vmem_cap = _tpu_vmem_capacity_bytes()
    safe_cap = _safe_vmem_cap(vmem_cap)
    vmem_limit = int(min(max(_vmem_estimate_bytes(tm, tk, dim), 32 << 20), safe_cap))

    out_dtype = jnp.float32 if ns > 1 else x.dtype
    grid = (ns, B // tm, nk_s)

    # Weights are re-streamed once per batch tile (per-core split reads its
    # own fraction, so total weight bytes are unchanged by ns).
    weight_bytes = (B // tm) * (w13.size + w2t.size) * 2
    io_bytes = ns * B * dim * 2 + B * dim * (4 if ns > 1 else 2)
    cost = pl.CostEstimate(
        flops=6 * B * dim * inter_dim,          # three dense matmuls
        transcendentals=B * inter_dim,          # sigmoid
        bytes_accessed=weight_bytes + io_bytes,
    )

    kernel = functools.partial(_mlp_kernel, tk=tk)
    partial_out = pl.pallas_call(
        kernel,
        out_shape=jax.ShapeDtypeStruct((ns, B, dim), out_dtype),
        grid_spec=pltpu.PrefetchScalarGridSpec(
            num_scalar_prefetch=0,
            grid=grid,
            in_specs=[
                # x tile: resident over the reduction axis.
                pl.BlockSpec((tm, dim), lambda c, i, k: (i, 0)),
                # [w1|w3] tile: contiguous (dim, 2*tk) slab per k-step, streamed.
                pl.BlockSpec((1, dim, 2 * tk), lambda c, i, k: (c * nk_s + k, 0, 0)),
                # w2 tile: contiguous (tk, dim) rows, streamed.
                pl.BlockSpec((tk, dim), lambda c, i, k: (c * nk_s + k, 0)),
            ],
            out_specs=pl.BlockSpec((1, tm, dim), lambda c, i, k: (c, i, 0)),
            scratch_shapes=[pltpu.VMEM((tm, dim), jnp.float32)],
        ),
        compiler_params=pltpu.CompilerParams(
            dimension_semantics=("parallel", "parallel", "arbitrary"),
            vmem_limit_bytes=vmem_limit,
        ),
        cost_estimate=cost,
    )(x, w13, w2t)

    if ns == 1:
        return partial_out[0]
    return partial_out.sum(axis=0).astype(x.dtype)


def mlp_pallas(x, w1, w2, w3, *, tm=None, tk=None, num_reduction_splits=1):
    """Convenience wrapper matching the PyTorch module signature.

    NOTE: in real inference, call prepare_mlp_weights() once at load time and
    reuse mlp_pallas_prepared() per forward (avoids per-call weight repacking).
    On v7x decode (B//tm == 1), pass num_reduction_splits=2 to use both TCs.
    """
    B, dim = x.shape
    inter_dim = w1.shape[0]
    vmem_cap = _tpu_vmem_capacity_bytes()
    if tk is None:
        tk = _choose_tk(dim, inter_dim, _weight_budget_bytes(vmem_cap))
    if tm is None:
        tm = _choose_tm(B, dim, tk, _safe_vmem_cap(vmem_cap))
    w13, w2t = prepare_mlp_weights(w1, w2, w3, tk=tk)
    return mlp_pallas_prepared(x, w13, w2t, tm=tm, tk=tk,
                               num_reduction_splits=num_reduction_splits)


def mlp_reference(x, w1, w2, w3):
    """Pure-JAX reference mirroring the PyTorch forward."""
    xf = x.astype(jnp.float32)
    h1 = xf @ w1.astype(jnp.float32).T
    h3 = xf @ w3.astype(jnp.float32).T
    gated = (h1 * jax.nn.sigmoid(h1) * h3).astype(jnp.bfloat16).astype(jnp.float32)
    y = gated @ w2.astype(jnp.float32).T
    return y.astype(jnp.bfloat16)


if __name__ == "__main__":
    # Small, MLP-consistent shapes that still exercise every grid axis:
    #   2 batch tiles (tm=128) x 4 inter tiles (tk=256), plus a 2-way
    #   reduction-split (v7x decode-style) variant.
    B, dim, inter_dim = 256, 256, 1024
    tm, tk = 128, 256

    key = jax.random.PRNGKey(0)
    kx, k1, k2, k3 = jax.random.split(key, 4)

    x = jax.random.normal(kx, (B, dim), dtype=jnp.float32).astype(jnp.bfloat16)
    w1 = (jax.random.normal(k1, (inter_dim, dim), dtype=jnp.float32) * 0.05).astype(jnp.bfloat16)
    w2 = (jax.random.normal(k2, (dim, inter_dim), dtype=jnp.float32) * 0.05).astype(jnp.bfloat16)
    w3 = (jax.random.normal(k3, (inter_dim, dim), dtype=jnp.float32) * 0.05).astype(jnp.bfloat16)

    y_ref = mlp_reference(x, w1, w2, w3)

    # One-time weight prep (model load), then the hot kernel call.
    w13, w2t = prepare_mlp_weights(w1, w2, w3, tk=tk)
    y = mlp_pallas_prepared(x, w13, w2t, tm=tm, tk=tk)
    jax.block_until_ready(y)

    # v7x decode-style path: single batch tile, reduction split across 2 cores.
    y_split = mlp_pallas_prepared(x, w13, w2t, tm=256, tk=tk, num_reduction_splits=2)
    jax.block_until_ready(y_split)

    # Auto-tiling convenience wrapper (generation-aware tile selection).
    y_auto = mlp_pallas(x, w1, w2, w3)
    jax.block_until_ready(y_auto)

    def max_err(a):
        return float(jnp.max(jnp.abs(a.astype(jnp.float32) - y_ref.astype(jnp.float32))))

    err, err_split, err_auto = max_err(y), max_err(y_split), max_err(y_auto)
    assert err < 5e-2, f"mismatch vs reference: {err}"
    assert err_split < 5e-2, f"reduction-split mismatch vs reference: {err_split}"
    assert err_auto < 5e-2, f"auto-tiled mismatch vs reference: {err_auto}"

    print("KERNEL_OK")
</pallas_src>

<mosaic_0001>
module attributes {stable_mosaic.version = 11 : i64} {
  func.func @_mlp_kernel(%arg0: i32, %arg1: i32, %arg2: i32, %arg3: memref<128x256xbf16, #tpu.memory_space<vmem>>, %arg4: memref<1x256x512xbf16, #tpu.memory_space<vmem>>, %arg5: memref<256x256xbf16, #tpu.memory_space<vmem>>, %arg6: memref<1x128x256xbf16, #tpu.memory_space<vmem>>, %arg7: memref<128x256xf32, #tpu.memory_space<vmem>>) attributes {dimension_semantics = [#tpu.dimension_semantics<parallel>, #tpu.dimension_semantics<parallel>, #tpu.dimension_semantics<arbitrary>], iteration_bounds = array<i64: 1, 2, 4>, scalar_prefetch = 0 : i64, scratch_operands = 1 : i64, tpu.core_type = #tpu.core_type<tc>, window_params = [{transform_indices = @transform_0, window_bounds = array<i64: 128, 256>}, {transform_indices = @transform_1, window_bounds = array<i64: 1, 256, 512>}, {transform_indices = @transform_2, window_bounds = array<i64: 256, 256>}, {transform_indices = @transform_3, window_bounds = array<i64: 1, 128, 256>}]} {
    %c0_i32 = arith.constant 0 : i32
    %0 = arith.cmpi eq, %arg2, %c0_i32 : i32
    %1 = arith.extui %0 : i1 to i32
    %c0_i32_0 = arith.constant 0 : i32
    %2 = arith.cmpi ne, %1, %c0_i32_0 : i32
    scf.if %2 {
      %cst_14 = arith.constant 0.000000e+00 : f32
      %25 = vector.broadcast %cst_14 : f32 to vector<128x256xf32>
      %c0_15 = arith.constant 0 : index
      %c0_16 = arith.constant 0 : index
      %26 = vector.load %arg7[%c0_15, %c0_16] : memref<128x256xf32, #tpu.memory_space<vmem>>, vector<128x256xf32>
      tpu.vector_store %arg7[%c0_15, %c0_16], %25 {strides = array<i32>} : memref<128x256xf32, #tpu.memory_space<vmem>>, vector<128x256xf32>,
    } else {
    }
    %c0 = arith.constant 0 : index
    %c0_1 = arith.constant 0 : index
    %3 = vector.load %arg3[%c0, %c0_1] : memref<128x256xbf16, #tpu.memory_space<vmem>>, vector<128x256xbf16>
    %c0_2 = arith.constant 0 : index
    %c0_3 = arith.constant 0 : index
    %c0_4 = arith.constant 0 : index
    %4 = vector.load %arg4[%c0_2, %c0_3, %c0_4] : memref<1x256x512xbf16, #tpu.memory_space<vmem>>, vector<1x256x512xbf16>
    %5 = vector.shape_cast %4 : vector<1x256x512xbf16> to vector<256x512xbf16>
    %cst = arith.constant dense<0.000000e+00> : vector<128x512xf32>
    %6 = tpu.matmul %3, %5, %cst {dimension_numbers = #tpu.dot_dimension_numbers<[1], [0], [0], [1], [0, 0, 1, 1], [], []>} : vector<128x256xbf16>, vector<256x512xbf16>, vector<128x512xf32> -> vector<128x512xf32>
    %7 = vector.extract_strided_slice %6 {offsets = [0, 0], sizes = [128, 256], strides = [1, 1]} : vector<128x512xf32> to vector<128x256xf32>
    %8 = vector.extract_strided_slice %6 {offsets = [0, 256], sizes = [128, 256], strides = [1, 1]} : vector<128x512xf32> to vector<128x256xf32>
    %9 = arith.negf %7 : vector<128x256xf32>
    %10 = math.exp %9 : vector<128x256xf32>
    %cst_5 = arith.constant 1.000000e+00 : f32
    %11 = vector.broadcast %cst_5 : f32 to vector<128x256xf32>
    %12 = arith.addf %11, %10 : vector<128x256xf32>
    %13 = arith.divf %11, %12 : vector<128x256xf32>
    %14 = arith.mulf %7, %13 : vector<128x256xf32>
    %15 = arith.mulf %14, %8 : vector<128x256xf32>
    %16 = arith.truncf %15 : vector<128x256xf32> to vector<128x256xbf16>
    %c0_6 = arith.constant 0 : index
    %c0_7 = arith.constant 0 : index
    %17 = vector.load %arg7[%c0_6, %c0_7] : memref<128x256xf32, #tpu.memory_space<vmem>>, vector<128x256xf32>
    %c0_8 = arith.constant 0 : index
    %c0_9 = arith.constant 0 : index
    %18 = vector.load %arg5[%c0_8, %c0_9] : memref<256x256xbf16, #tpu.memory_space<vmem>>, vector<256x256xbf16>
    %cst_10 = arith.constant dense<0.000000e+00> : vector<128x256xf32>
    %19 = tpu.matmul %16, %18, %cst_10 {dimension_numbers = #tpu.dot_dimension_numbers<[1], [0], [0], [1], [0, 0, 1, 1], [], []>} : vector<128x256xbf16>, vector<256x256xbf16>, vector<128x256xf32> -> vector<128x256xf32>
    %20 = arith.addf %17, %19 : vector<128x256xf32>
    %c0_11 = arith.constant 0 : index
    %c0_12 = arith.constant 0 : index
    %21 = vector.load %arg7[%c0_11, %c0_12] : memref<128x256xf32, #tpu.memory_space<vmem>>, vector<128x256xf32>
    tpu.vector_store %arg7[%c0_11, %c0_12], %20 {strides = array<i32>} : memref<128x256xf32, #tpu.memory_space<vmem>>, vector<128x256xf32>,
    %c3_i32 = arith.constant 3 : i32
    %22 = arith.cmpi eq, %arg2, %c3_i32 : i32
    %23 = arith.extui %22 : i1 to i32
    %c0_i32_13 = arith.constant 0 : i32
    %24 = arith.cmpi ne, %23, %c0_i32_13 : i32
    scf.if %24 {
      %c0_14 = arith.constant 0 : index
      %c0_15 = arith.constant 0 : index
      %25 = vector.load %arg7[%c0_14, %c0_15] : memref<128x256xf32, #tpu.memory_space<vmem>>, vector<128x256xf32>
      %26 = arith.truncf %25 : vector<128x256xf32> to vector<128x256xbf16>
      %c0_16 = arith.constant 0 : index
      %c0_17 = arith.constant 0 : index
      %c0_18 = arith.constant 0 : index
      %27 = vector.load %arg6[%c0_16, %c0_17, %c0_18] : memref<1x128x256xbf16, #tpu.memory_space<vmem>>, vector<1x128x256xbf16>
      %28 = vector.shape_cast %27 : vector<1x128x256xbf16> to vector<128x256xbf16>
      %29 = vector.shape_cast %26 : vector<128x256xbf16> to vector<1x128x256xbf16>
      tpu.vector_store %arg6[%c0_16, %c0_17, %c0_18], %29 {strides = array<i32>} : memref<1x128x256xbf16, #tpu.memory_space<vmem>>, vector<1x128x256xbf16>,
    } else {
    }
    return
  }
  func.func @transform_0(%arg0: i32, %arg1: i32, %arg2: i32) -> (i32, i32) {
    %c0_i32 = arith.constant 0 : i32
    %c0_i32_0 = arith.constant 0 : i32
    return %arg1, %c0_i32 : i32, i32
  }
  func.func @transform_1(%arg0: i32, %arg1: i32, %arg2: i32) -> (i32, i32, i32) {
    %c4_i32 = arith.constant 4 : i32
    %0 = arith.muli %arg0, %c4_i32 : i32
    %1 = arith.addi %0, %arg2 : i32
    %c0_i32 = arith.constant 0 : i32
    %c0_i32_0 = arith.constant 0 : i32
    %c0_i32_1 = arith.constant 0 : i32
    return %1, %c0_i32, %c0_i32_0 : i32, i32, i32
  }
  func.func @transform_2(%arg0: i32, %arg1: i32, %arg2: i32) -> (i32, i32) {
    %c4_i32 = arith.constant 4 : i32
    %0 = arith.muli %arg0, %c4_i32 : i32
    %1 = arith.addi %0, %arg2 : i32
    %c0_i32 = arith.constant 0 : i32
    %c0_i32_0 = arith.constant 0 : i32
    return %1, %c0_i32 : i32, i32
  }
  func.func @transform_3(%arg0: i32, %arg1: i32, %arg2: i32) -> (i32, i32, i32) {
    %c0_i32 = arith.constant 0 : i32
    %c0_i32_0 = arith.constant 0 : i32
    return %arg0, %arg1, %c0_i32 : i32, i32, i32
  }
}

</mosaic_0001>

<bundles_post_ra>
// kernel: tpu_custom_call.1
= control target key start
LH: loop header
LB: loop body
LE: loop exit
PB: predicated region body
PF: predicated region fallthrough
CT: control target
= control target key end

     0   :  { %s3639_s0 = inlined_call_operand.hbm [shape: bf16[256,256], index: 0, kind: input, shape index: {}]   ;;  %s3640_s1 = inlined_call_operand.hbm [shape: bf16[4,256,512], index: 1, kind: input, shape index: {}]   ;;  %s3641_s2 = inlined_call_operand.hbm [shape: bf16[1024,256], index: 2, kind: input, shape index: {}]   ;;  %s3642_s3 = inlined_call_operand.hbm [shape: bf16[1,256,256], index: 3, kind: output, shape index: {}]  }
   0x1   :  { %3656 = sst [smem:[#allocation19_spill]] %s3640_s1 }
   0x2   :  { %3657 = sst [smem:[#allocation20_spill]] %s3642_s3 }
   0x3   :  { %8 = vsyncpa [#allocation4], 0 }
   0x4   :  { %10 = vsyncpa [#allocation4 + $0x1], 0 }
   0x5   :  { %11 = vsyncpa [#allocation7], 0 }
   0x6   :  { %13 = vsyncpa [#allocation7 + $0x1], 0 }
   0x7   :  { %14 = vsyncpa [#allocation5], 0 }
   0x8   :  { %16 = vsyncpa [#allocation5 + $0x1], 0  ;;  %s2932_s12 = smov 0   ;;  %s2934_s13 = smov 0  }
   0x9   :  { %s2936_s14 = smov 0   ;;  %s2938_s15 = smov 0  }
   0xa   :  { %s2940_s16 = smov 0   ;;  %s2942_s17 = smov 0  }
   0xb   :  { %s2944_s18 = smov 0   ;;  %s2946_s19 = smov 0  }
   0xc   :  { %s2948_s20 = smov 0   ;;  %s2950_s21 = smov 0  }
   0xd   :  { %s2952_s22 = smov 0  }
   0xe LB: > { %3658 = sst [smem:[#allocation13_spill]] %s2867_s14  ;;  %s2986_s23 = sadd.s32 4294967295, %s2899_s22   ;;  %s2899_s22 = sphi %s2952_s22, %s22_s22   ;;  %s2895_s21 = sphi %s2950_s21, %s3690_s21   ;;  %s2891_s20 = sphi %s2948_s20, %s3697_s20   ;;  %s2887_s19 = sphi %s2946_s19, %s3688_s19   ;;  %s2883_s18 = sphi %s2944_s18, %s3696_s18   ;;  %s2879_s17 = sphi %s2942_s17, %s3695_s17   ;;  %s2875_s16 = sphi %s2940_s16, %s3694_s16   ;;  %s2871_s15 = sphi %s2938_s15, %s3693_s15   ;;  %s2867_s14 = sphi %s2936_s14, %s3687_s14   ;;  %s2863_s13 = sphi %s2934_s13, %s3692_s13   ;;  %s2859_s12 = sphi %s2932_s12, %s3691_s12  }
   0xf   : > { %3659 = sst [smem:[#allocation14_spill]] %s2871_s15  ;;  %s34_s24 = sadd.s32 1, %s2891_s20 }
  0x10   : > { %3660 = sst [smem:[#allocation15_spill]] %s2895_s21  ;;  %p2989_p0 = scmp.ge.s32.totalorder %s34_s24, 4 }
  0x11   : > { %p3646_p1 = scmp.eq.s32.totalorder %s2899_s22, 0  ;;  %p3645_p2 = scmp.eq.s32.totalorder %s2986_s23, 0 }
  0x12   : > { %s78_s26 = sadd.s32 1, %s2867_s14  ;;  %s3699_s24 = smov (%p2989_p0, %s34_s24), 0 }
  0x13   : > { %3662 = sst [smem:[#allocation16_spill]] %s3699_s24  ;;  %p85_p3 = scmp.ne.s32.totalorder %s2867_s14, %s2863_s13 }
  0x14   : > { %p91_p4 = scmp.ne.s32.totalorder %s2863_s13, %s2859_s12  ;;  %s75_s27 = ssub.s32 %s2891_s20, %s3699_s24 }
  0x15   : > { %p76_p5 = scmp.eq.s32.totalorder %s75_s27, 0  ;;  %p87_p6 = por %p85_p3, %p3646_p1 }
  0x16   : > { %p3009_p7 = por %p91_p4, %p3645_p2  ;;  %p3644_p8 = scmp.lt.s32.totalorder %s2899_s22, 8 }
  0x17   : > { %s3015_s29 = scalar_select %p76_p5, %s2867_s14, %s78_s26  }
  0x18   : > { %s3663_s28 = scalar_select %p3009_p7, 1, 0 }
  0x19   : > { %3664 = sst [smem:[#allocation17_spill]] %s3015_s29  ;;  %s195_s30 = sand.u32 1, %s2899_s22  }
  0x1a   : > { %s197_s4 = sand.u32 1, %s2867_s14   ;;  %s2215_s6 = sshll.u32 %s2891_s20, 13 }
  0x1b   : > { %s2033_s5 = sshll.u32 %s197_s4, 9  ;;  %s3665_s1 = sld [smem:[#allocation19_spill]] }
  0x1c   : > { %s199_s10 = scalar_lea.vmem [#allocation6], %s2033_s5  ;;  %p3029_p9 = pnand %p3644_p8, %p87_p6 }
  0x1d   : > { %s208_s11 = sshll.u32 %s199_s10, 4  ;;  %s3033_s26 = sshll.u32 %s197_s4, 8  ;;  %s3025_s11 = int_to_ptr.vmem [resolvable:$true] %s208_s11 }
  0x1e   : > { %s3035_s27 = scalar_lea.sflag [#allocation7], %s195_s30  ;;  %p3653_p11 = pneg %p3029_p9 }
  0x21   : > { %s3023_s9 = scalar_lea.hbm %s3665_s1, %s2215_s6  ;;  %s2688_s8 = scalar_lea.hbm %s3665_s1, 32768 }
  0x22   : > { %s2683_s6 = scalar_lea.hbm %s3023_s9, 8192  ;;  %p2689_p3 = scmp.lt.u32.totalorder %s3023_s9, %s3665_s1 }
  0x23   : > { %p2684_p10 = scmp.ne.s32.totalorder %s3023_s9, %s2683_s6  ;;  %p2690_p4 = scmp.lt.u32.totalorder %s2688_s8, %s2683_s6 }
  0x24   : > { %p2692_p6 = scmp.lt.u32.totalorder %s2683_s6, %s3023_s9 }
  0x25   : > { %p2686_p12 = pnand %p3653_p11, %p2684_p10  ;;  %p2691_p5 = por %p2690_p4, %p2689_p3 }
  0x27   : > { %p2687_p13 = pneg %p2686_p12  ;;  %p2693_p8 = por %p2692_p6, %p2691_p5 }
  0x29   : > { %p2694_p2 = pnand %p2693_p8, %p2687_p13 }
  0x2b   : > { %2697 = shalt.err (!%p2694_p2)
}
  0x2c   : > { %s2698_s30 = scalar_lea.vmem %s3025_s11, 8192  ;;  %s2901_s4 = smov [#allocation6]  }
  0x2d   : > { %p2699_p10 = scmp.ne.s32.totalorder %s3025_s11, %s2698_s30  ;;  %s2703_s5 = sshll.u32 %s2901_s4, 4  ;;  %s2704_s5 = int_to_ptr.vmem [resolvable:$false] %s2703_s5 }
  0x2e   : > { %s2705_s24 = scalar_lea.vmem %s2704_s5, 16384  ;;  %p2706_p7 = scmp.lt.s32.totalorder %s3025_s11, %s2704_s5 }
  0x2f   : > { %p2701_p12 = pnand %p2699_p10, %p3653_p11  ;;  %p2707_p3 = scmp.lt.s32.totalorder %s2705_s24, %s2698_s30 }
  0x31   : > { %p2702_p1 = pneg %p2701_p12  ;;  %p2708_p4 = por %p2707_p3, %p2706_p7 }
  0x33   : > { %p2709_p5 = pnand %p2708_p4, %p2702_p1 }
  0x35   : > { %2712 = shalt.err (!%p2709_p5)
}
  0x36   : > { %s2902_s6 = smov 256   ;;  %s2903_s7 = smov 16  }
  0x37   : > { %2282 = dma.hbm_to_vmem [thread:$0]  (!%p3029_p9), %s3023_s9, 8192, %s3025_s11, %s3035_s27, %s2902_s6, %s2902_s6, %s2903_s7  }
  0x38   : > { %p2040_p1 = scmp.ge.s32.totalorder %s2899_s22, 1  ;;  %s222_s8 = scalar_lea.vmem [#allocation8], %s3033_s26 }
  0x39   : > { %s3065_s10 = sshll.u32 %s222_s8, 4  ;;  %p240_p2 = scmp.lt.s32.totalorder %s2899_s22, 9  ;;  %s3167_s10 = int_to_ptr.vmem [resolvable:$true] %s3065_s10 }
  0x3a   : > { %s2026_s4 = sadd.s32 4294967294, %s2899_s22   ;;  %s37_s5 = sadd.s32 1, %s2895_s21 }
  0x3b   : > { %p3068_p7 = pnand %p2040_p1, %p240_p2  ;;  %s48_s24 = sadd.s32 1, %s2879_s17 }
  0x3c   : > { %s3701_s5 = smov (!%p2989_p0, %s37_s5), %s2895_s21  ;;  %p55_p8 = scmp.ne.s32.totalorder %s2879_s17, %s2875_s16 }
  0x3d   : > { %s3667_s30 = scalar_select %p3068_p7, 1, 0 }
  0x3e   : > { %p61_p13 = scmp.ne.s32.totalorder %s2875_s16, %s2871_s15  ;;  %p39_p6 = scmp.ge.s32.totalorder %s3701_s5, 2 }
  0x3f   : > { %p147_p10 = scmp.eq.s32.totalorder %s2986_s23, 7  ;;  %p3668_p12 = scmp.eq.s32.totalorder %s2899_s22, 0 }
  0x40   : > { %p3670_p4 = scmp.eq.s32.totalorder %s2986_s23, 0  ;;  %s3703_s5 = smov (%p39_p6, %s3701_s5), 0 }
  0x41   : > { %p3085_p3 = por %p3668_p12, %p55_p8  ;;  %3672 = sst [smem:[#allocation18_spill]] %s3703_s5 }
  0x42   : > { %p3091_p5 = por %p3670_p4, %p61_p13  ;;  %p3097_p0 = por %p147_p10, %p55_p8 }
  0x43   : > { %p153_p1 = scmp.eq.s32.totalorder %s2026_s4, 7  ;;  %s45_s26 = ssub.s32 %s2895_s21, %s3703_s5 }
  0x44   : > { %s3671_s11 = scalar_select %p3091_p5, 1, 0 }
  0x45   : > { %s3673_s25 = scalar_select %p3097_p0, 1, 0 }
  0x46   : > { %s173_s6 = sand.u32 1, %s2879_s17   ;;  %p46_p2 = scmp.eq.s32.totalorder %s45_s26, 0 }
  0x47   : > { %p3104_p12 = por %p153_p1, %p61_p13  ;;  %s2029_s8 = sshll.u32 %s173_s6, 7 }
  0x48   : > { %s3109_s1 = scalar_select %p46_p2, %s2879_s17, %s48_s24  }
  0x49   : > { %s3674_s7 = scalar_select %p3104_p12, 1, 0 }
  0x4a   : > { %s2214_s29 = sshll.u32 %s2895_s21, 11  ;;  %s177_s4 = scalar_lea.vmem [#allocation3], %s2029_s8 }
  0x4b   : > { %s3115_s3 = scalar_lea.hbm %s3639_s0, %s2214_s29  ;;  %s185_s5 = sshll.u32 %s177_s4, 4  ;;  %s3117_s5 = int_to_ptr.vmem [resolvable:$true] %s185_s5 }
  0x4c   : > { %p3675_p8 = scmp.lt.s32.totalorder %s2899_s22, 8  ;;  %s2217_s24 = sshll.u32 %s2891_s20, 12 }
  0x4d   : > { %s3128_s14 = scalar_lea.sflag [#allocation4], %s173_s6  ;;  %s2713_s15 = scalar_lea.hbm %s3115_s3, 2048 }
  0x4e   : > { %p3123_p13 = pnand %p3675_p8, %p3085_p3  ;;  %p2714_p6 = scmp.ne.s32.totalorder %s3115_s3, %s2713_s15 }
  0x4f   : > { %s2718_s8 = scalar_lea.hbm %s3639_s0, 4096  ;;  %p2719_p3 = scmp.lt.u32.totalorder %s3115_s3, %s3639_s0 }
  0x50   : > { %p2715_p10 = pneg %p3123_p13  ;;  %p2720_p2 = scmp.lt.u32.totalorder %s2718_s8, %s2713_s15 }
  0x51   : > { %p2722_p11 = scmp.lt.u32.totalorder %s2713_s15, %s3115_s3 }
  0x52   : > { %p2716_p4 = pnand %p2715_p10, %p2714_p6  ;;  %p2721_p8 = por %p2720_p2, %p2719_p3 }
  0x54   : > { %p2717_p1 = pneg %p2716_p4  ;;  %p2723_p12 = por %p2722_p11, %p2721_p8 }
  0x56   : > { %p2724_p0 = pnand %p2723_p12, %p2717_p1 }
  0x58   : > { %2727 = shalt.err (!%p2724_p0)
}
  0x59   : > { %s2728_s6 = scalar_lea.vmem %s3117_s5, 2048  ;;  %s2904_s29 = smov [#allocation3]  }
  0x5a   : > { %p2729_p6 = scmp.ne.s32.totalorder %s3117_s5, %s2728_s6  ;;  %s2733_s9 = sshll.u32 %s2904_s29, 4  ;;  %s2734_s9 = int_to_ptr.vmem [resolvable:$false] %s2733_s9 }
  0x5b   : > { %s2735_s21 = scalar_lea.vmem %s2734_s9, 4096  ;;  %p2736_p7 = scmp.lt.s32.totalorder %s3117_s5, %s2734_s9 }
  0x5c   : > { %p2731_p4 = pnand %p2729_p6, %p2715_p10  ;;  %p2737_p3 = scmp.lt.s32.totalorder %s2735_s21, %s2728_s6 }
  0x5e   : > { %p2732_p5 = pneg %p2731_p4  ;;  %p2738_p2 = por %p2737_p3, %p2736_p7 }
  0x60   : > { %p2739_p11 = pnand %p2738_p2, %p2732_p5 }
  0x62   : > { %2742 = shalt.err (!%p2739_p11)
}
  0x63   : > { %s2905_s15 = smov 128   ;;  %s2906_s8 = smov 8  }
  0x64   : > { %2279 = dma.hbm_to_vmem [thread:$0]  (!%p3123_p13), %s3115_s3, 2048, %s3117_s5, %s3128_s14, %s2905_s15, %s2905_s15, %s2906_s8  }
  0x65   : > { %s3164_s29 = scalar_lea.hbm %s3641_s2, %s2217_s24  ;;  %p3677_p5 = pneg %p3029_p9 }
  0x66   : > { %s2743_s9 = scalar_lea.hbm %s3164_s29, 4096  ;;  %s2748_s5 = scalar_lea.hbm %s3641_s2, 16384 }
  0x67   : > { %p2744_p7 = scmp.ne.s32.totalorder %s3164_s29, %s2743_s9  ;;  %p2749_p13 = scmp.lt.u32.totalorder %s3164_s29, %s3641_s2 }
  0x68   : > { %p2750_p10 = scmp.lt.u32.totalorder %s2748_s5, %s2743_s9  ;;  %p2752_p8 = scmp.lt.u32.totalorder %s2743_s9, %s3164_s29 }
  0x69   : > { %p2746_p0 = pnand %p2744_p7, %p3677_p5 }
  0x6a   : > { %p2751_p1 = por %p2750_p10, %p2749_p13 }
  0x6b   : > { %p2747_p12 = pneg %p2746_p0 }
  0x6c   : > { %p2753_p6 = por %p2752_p8, %p2751_p1 }
  0x6e   : > { %p2754_p4 = pnand %p2753_p6, %p2747_p12 }
  0x70   : > { %2757 = shalt.err (!%p2754_p4)
}
  0x71   : > { %s2758_s24 = scalar_lea.vmem %s3167_s10, 4096  ;;  %p3678_p2 = pmov %p3677_p5 }
  0x72   : > { %p2759_p3 = scmp.ne.s32.totalorder %s3167_s10, %s2758_s24  ;;  %s2907_s4 = smov [#allocation8]  }
  0x73   : > { %s2763_s6 = sshll.u32 %s2907_s4, 4  ;;  %s2764_s6 = int_to_ptr.vmem [resolvable:$false] %s2763_s6 }
  0x74   : > { %p2761_p11 = pnand %p2759_p3, %p3678_p2  ;;  %s2765_s26 = scalar_lea.vmem %s2764_s6, 8192 }
  0x75   : > { %p2766_p5 = scmp.lt.s32.totalorder %s3167_s10, %s2764_s6  ;;  %p2767_p0 = scmp.lt.s32.totalorder %s2765_s26, %s2758_s24 }
  0x76   : > { %p2762_p7 = pneg %p2761_p11 }
  0x77   : > { %p2768_p13 = por %p2767_p0, %p2766_p5 }
  0x79   : > { %p2769_p10 = pnand %p2768_p13, %p2762_p7 }
  0x7b   : > { %2772 = shalt.err (!%p2769_p10)
}
  0x7c   : > { %2285 = dma.hbm_to_vmem [thread:$0]  (!%p3029_p9), %s3164_s29, 4096, %s3167_s10, %s3035_s27, %s2905_s15, %s2905_s15, %s2906_s8  }
  0x7d   : > { %p3679_p12 = scmp.ne.s32.totalorder %s3667_s30, 0 }
  0x7e   : > { %s3199_s9 = sand.u32 (!%p3679_p12), 1, %s2875_s16   ;;  %p3680_p1 = scmp.ne.s32.totalorder (!%p3679_p12), %s3671_s11, 0 }
  0x7f   : > { %244 = sbr.rel (%p3679_p12) target bundleno = 786 (0x312), region = 32  ;;  %s2041_s3 = sshll.u32 (!%p3679_p12), %s3199_s9, 7 }
  0x80   : > { %s247_s5 = scalar_lea.sflag (!%p3679_p12), [#allocation4], %s3199_s9  ;;  %s3203_s14 = scalar_lea.vmem (!%p3679_p12), [#allocation3], %s2041_s3 }
  0x86   : > { %2846 = dma.done.wait (%p3680_p1), %s247_s5, 2048  }
  0x87   : > { %2848 = vsyncadd (%p3680_p1), %s247_s5, 4294965248  ;;  %s255_s12 = sand.u32 1, %s2986_s23   ;;  %s257_s27 = sand.u32 1, %s2863_s13  }
  0x88   : > { %s2042_s10 = sshll.u32 %s257_s27, 9  ;;  %s256_s30 = scalar_lea.sflag [#allocation7], %s255_s12 }
  0x89   : > { %s3211_s15 = scalar_lea.vmem [#allocation6], %s2042_s10  ;;  %p3681_p9 = scmp.ne.s32.totalorder %s3663_s28, 0 }
  0x8b   : > { %2850 = dma.done.wait (%p3681_p9), %s256_s30, 12288  }
  0x8c   : > { %2852 = vsyncadd (%p3681_p9), %s256_s30, 4294955008  ;;  %s2043_s8 = sshll.u32 %s257_s27, 8  ;;  %s3219_s21 = scalar_lea.vmem [#allocation9], %s2041_s3 }
  0x8d   : > { %s3217_s29 = scalar_lea.vmem [#allocation8], %s2043_s8  ;;  %p2045_p8 = scmp.ne.s32.totalorder %s2883_s18, 0 }
  0x8e   : > { %v2908_v0 = vmov (!%p2045_p8), 0.0  }
  0x8f   : > { %311 = sbr.rel (%p2045_p8) target bundleno = 159 (0x9f), region = 48  ;;  %312 = vst [vmem:[#allocation2] sm:$0xff] (!%p2045_p8), %v2908_v0  ;;  %313 = vst [vmem:[#allocation2 + $0x8] sm:$0xff] (!%p2045_p8), %v2908_v0 }
  0x90   : > { %314 = vst [vmem:[#allocation2 + $0x10] sm:$0xff] (!%p2045_p8), %v2908_v0  ;;  %315 = vst [vmem:[#allocation2 + $0x18] sm:$0xff] (!%p2045_p8), %v2908_v0 }
  0x91   : > { %316 = vst [vmem:[#allocation2 + $0x20] sm:$0xff] (!%p2045_p8), %v2908_v0  ;;  %317 = vst [vmem:[#allocation2 + $0x28] sm:$0xff] (!%p2045_p8), %v2908_v0 }
  0x92   : > { %318 = vst [vmem:[#allocation2 + $0x30] sm:$0xff] (!%p2045_p8), %v2908_v0  ;;  %319 = vst [vmem:[#allocation2 + $0x38] sm:$0xff] (!%p2045_p8), %v2908_v0 }
  0x93   : > { %320 = vst [vmem:[#allocation2 + $0x40] sm:$0xff] (!%p2045_p8), %v2908_v0  ;;  %321 = vst [vmem:[#allocation2 + $0x48] sm:$0xff] (!%p2045_p8), %v2908_v0 }
  0x94   : > { %322 = vst [vmem:[#allocation2 + $0x50] sm:$0xff] (!%p2045_p8), %v2908_v0  ;;  %323 = vst [vmem:[#allocation2 + $0x58] sm:$0xff] (!%p2045_p8), %v2908_v0 }
  0x95   : > { %324 = vst [vmem:[#allocation2 + $0x60] sm:$0xff] (!%p2045_p8), %v2908_v0  ;;  %325 = vst [vmem:[#allocation2 + $0x68] sm:$0xff] (!%p2045_p8), %v2908_v0 }
  0x96   : > { %326 = vst [vmem:[#allocation2 + $0x70] sm:$0xff] %v2908_v0  ;;  %327 = vst [vmem:[#allocation2 + $0x78] sm:$0xff] %v2908_v0 }
  0x97   : > { %328 = vst [vmem:[#allocation2 + $0x80] sm:$0xff] %v2908_v0  ;;  %329 = vst [vmem:[#allocation2 + $0x88] sm:$0xff] %v2908_v0 }
  0x98   : > { %330 = vst [vmem:[#allocation2 + $0x90] sm:$0xff] %v2908_v0  ;;  %331 = vst [vmem:[#allocation2 + $0x98] sm:$0xff] %v2908_v0 }
  0x99   : > { %332 = vst [vmem:[#allocation2 + $0xa0] sm:$0xff] %v2908_v0  ;;  %333 = vst [vmem:[#allocation2 + $0xa8] sm:$0xff] %v2908_v0 }
  0x9a   : > { %334 = vst [vmem:[#allocation2 + $0xb0] sm:$0xff] %v2908_v0  ;;  %335 = vst [vmem:[#allocation2 + $0xb8] sm:$0xff] %v2908_v0 }
  0x9b   : > { %336 = vst [vmem:[#allocation2 + $0xc0] sm:$0xff] %v2908_v0  ;;  %337 = vst [vmem:[#allocation2 + $0xc8] sm:$0xff] %v2908_v0 }
  0x9c   : > { %338 = vst [vmem:[#allocation2 + $0xd0] sm:$0xff] %v2908_v0  ;;  %339 = vst [vmem:[#allocation2 + $0xd8] sm:$0xff] %v2908_v0 }
  0x9d   : > { %340 = vst [vmem:[#allocation2 + $0xe0] sm:$0xff] %v2908_v0  ;;  %341 = vst [vmem:[#allocation2 + $0xe8] sm:$0xff] %v2908_v0 }
  0x9e   : > { %342 = vst [vmem:[#allocation2 + $0xf0] sm:$0xff] %v2908_v0  ;;  %343 = vst [vmem:[#allocation2 + $0xf8] sm:$0xff] %v2908_v0 }
  0x9f PF: > { %v2387_v1 = vld [vmem:[%s3211_s15 + $0x4] ss:$16 sps:$4 sm:$0xff]   ;;  %v2389_v2 = vld [vmem:[%s3211_s15] ss:$16 sps:$4 sm:$0xff]   ;;  %v2408_v8 = vld [vmem:[%s3211_s15 + $0xc] ss:$16 sps:$4 sm:$0xff]  }
  0xa0   : > { %824 = vmatprep.subr.bf16.mxu0 %v2387_v1  ;;  %v2390_v3 = vld [vmem:[%s3211_s15 + $0x24] ss:$16 sps:$4 sm:$0xff]   ;;  %v2392_v4 = vld [vmem:[%s3211_s15 + $0x20] ss:$16 sps:$4 sm:$0xff]   ;;  %v2410_v9 = vld [vmem:[%s3211_s15 + $0x8] ss:$16 sps:$4 sm:$0xff]   ;;  %937 = vmatprep.subr.bf16.mxu1 %v2408_v8 }
  0xa1   : > { %825 = vmatpush1.bf16.msra.mxu0 %v2389_v2  ;;  %v2393_v5 = vld [vmem:[%s3211_s15 + $0x44] ss:$16 sps:$4 sm:$0xff]   ;;  %v2395_v6 = vld [vmem:[%s3211_s15 + $0x40] ss:$16 sps:$4 sm:$0xff]   ;;  %v2414_v12 = vld [vmem:[%s3211_s15 + $0x2c] ss:$16 sps:$4 sm:$0xff]   ;;  %938 = vmatpush1.bf16.msra.mxu1 %v2410_v9 }
  0xa2   : > { %826 = vmatprep.subr.bf16.mxu0 %v2390_v3  ;;  %v2396_v7 = vld [vmem:[%s3211_s15 + $0x64] ss:$16 sps:$4 sm:$0xff]   ;;  %v2398_v10 = vld [vmem:[%s3211_s15 + $0x60] ss:$16 sps:$4 sm:$0xff]   ;;  %v2416_v13 = vld [vmem:[%s3211_s15 + $0x28] ss:$16 sps:$4 sm:$0xff]   ;;  %939 = vmatprep.subr.bf16.mxu1 %v2414_v12 }
  0xa3   : > { %v2399_v11 = vld [vmem:[%s3211_s15 + $0x84] ss:$16 sps:$4 sm:$0xff]   ;;  %v2401_v14 = vld [vmem:[%s3211_s15 + $0x80] ss:$16 sps:$4 sm:$0xff]   ;;  %v2420_v15 = vld [vmem:[%s3211_s15 + $0x4c] ss:$16 sps:$4 sm:$0xff]  }
  0xa4   : > { %v2402_v16 = vld [vmem:[%s3211_s15 + $0xa4] ss:$16 sps:$4 sm:$0xff]   ;;  %v2422_v17 = vld [vmem:[%s3211_s15 + $0x48] ss:$16 sps:$4 sm:$0xff]   ;;  %v2426_v18 = vld [vmem:[%s3211_s15 + $0x6c] ss:$16 sps:$4 sm:$0xff]  }
  0xa5   : > { %827 = vmatpush1.bf16.msra.mxu0 %v2392_v4  ;;  %940 = vmatpush1.bf16.msra.mxu1 %v2416_v13  ;;  %v2404_v19 = vld [vmem:[%s3211_s15 + $0xa0] ss:$16 sps:$4 sm:$0xff]   ;;  %v2405_v20 = vld [vmem:[%s3211_s15 + $0xc4] ss:$16 sps:$4 sm:$0xff]   ;;  %v2428_v21 = vld [vmem:[%s3211_s15 + $0x68] ss:$16 sps:$4 sm:$0xff]  }
  0xa6   : > { %828 = vmatprep.subr.bf16.mxu0 %v2393_v5  ;;  %941 = vmatprep.subr.bf16.mxu1 %v2420_v15  ;;  %v2432_v22 = vld [vmem:[%s3211_s15 + $0x8c] ss:$16 sps:$4 sm:$0xff]   ;;  %v2407_v23 = vld [vmem:[%s3211_s15 + $0xc0] ss:$16 sps:$4 sm:$0xff]   ;;  %v2411_v24 = vld [vmem:[%s3211_s15 + $0xe4] ss:$16 sps:$4 sm:$0xff]  }
  0xa7   : > { %v2434_v25 = vld [vmem:[%s3211_s15 + $0x88] ss:$16 sps:$4 sm:$0xff]   ;;  %v2438_v26 = vld [vmem:[%s3211_s15 + $0xac] ss:$16 sps:$4 sm:$0xff]   ;;  %v2413_v27 = vld [vmem:[%s3211_s15 + $0xe0] ss:$16 sps:$4 sm:$0xff]  }
  0xa8   : > { %v2417_v28 = vld [vmem:[%s3211_s15 + $0x104] ss:$16 sps:$4 sm:$0xff]   ;;  %v2440_v29 = vld [vmem:[%s3211_s15 + $0xa8] ss:$16 sps:$4 sm:$0xff]   ;;  %v2444_v30 = vld [vmem:[%s3211_s15 + $0xcc] ss:$16 sps:$4 sm:$0xff]  }
  0xa9   : > { %829 = vmatpush1.bf16.msra.mxu0 %v2395_v6  ;;  %942 = vmatpush1.bf16.msra.mxu1 %v2422_v17  ;;  %v2419_v31 = vld [vmem:[%s3211_s15 + $0x100] ss:$16 sps:$4 sm:$0xff]   ;;  %v2423_v32 = vld [vmem:[%s3211_s15 + $0x124] ss:$16 sps:$4 sm:$0xff]   ;;  %v2446_v33 = vld [vmem:[%s3211_s15 + $0xc8] ss:$16 sps:$4 sm:$0xff]  }
  0xaa   : > { %830 = vmatprep.subr.bf16.mxu0 %v2396_v7  ;;  %943 = vmatprep.subr.bf16.mxu1 %v2426_v18  ;;  %v2450_v34 = vld [vmem:[%s3211_s15 + $0xec] ss:$16 sps:$4 sm:$0xff]   ;;  %v2425_v35 = vld [vmem:[%s3211_s15 + $0x120] ss:$16 sps:$4 sm:$0xff]   ;;  %v2429_v37 = vld [vmem:[%s3211_s15 + $0x144] ss:$16 sps:$4 sm:$0xff]  }
  0xab   : > { %v2467_v36 = vld [vmem:[%s3203_s14 + $0x4] ss:$8 sps:$4 sm:$0xff]   ;;  %v2452_v38 = vld [vmem:[%s3211_s15 + $0xe8] ss:$16 sps:$4 sm:$0xff]   ;;  %v2431_v40 = vld [vmem:[%s3211_s15 + $0x140] ss:$16 sps:$4 sm:$0xff]  }
  0xac   : > { %856 = vmatprep.mubr.bf16.mxu0 %v2467_v36  ;;  %v2456_v39 = vld [vmem:[%s3211_s15 + $0x10c] ss:$16 sps:$4 sm:$0xff]   ;;  %969 = vmatprep.mubr.bf16.mxu1 %v2467_v36  ;;  %v2435_v41 = vld [vmem:[%s3211_s15 + $0x164] ss:$16 sps:$4 sm:$0xff]   ;;  %v2458_v42 = vld [vmem:[%s3211_s15 + $0x108] ss:$16 sps:$4 sm:$0xff]  }
  0xad   : > { %831 = vmatpush1.bf16.msra.mxu0 %v2398_v10  ;;  %944 = vmatpush1.bf16.msra.mxu1 %v2428_v21  ;;  %v2462_v43 = vld [vmem:[%s3211_s15 + $0x12c] ss:$16 sps:$4 sm:$0xff]   ;;  %v2437_v44 = vld [vmem:[%s3211_s15 + $0x160] ss:$16 sps:$4 sm:$0xff]   ;;  %v2441_v45 = vld [vmem:[%s3211_s15 + $0x184] ss:$16 sps:$4 sm:$0xff]  }
  0xae   : > { %832 = vmatprep.subr.bf16.mxu0 %v2399_v11  ;;  %945 = vmatprep.subr.bf16.mxu1 %v2432_v22  ;;  %v2464_v46 = vld [vmem:[%s3211_s15 + $0x128] ss:$16 sps:$4 sm:$0xff]   ;;  %v2468_v47 = vld [vmem:[%s3211_s15 + $0x14c] ss:$16 sps:$4 sm:$0xff]   ;;  %v2443_v48 = vld [vmem:[%s3211_s15 + $0x180] ss:$16 sps:$4 sm:$0xff]  }
  0xaf   : > { %v2447_v49 = vld [vmem:[%s3211_s15 + $0x1a4] ss:$16 sps:$4 sm:$0xff]   ;;  %v2470_v50 = vld [vmem:[%s3211_s15 + $0x148] ss:$16 sps:$4 sm:$0xff]   ;;  %v2471_v51 = vld [vmem:[%s3211_s15 + $0x16c] ss:$16 sps:$4 sm:$0xff]  }
  0xb0   : > { %v2449_v52 = vld [vmem:[%s3211_s15 + $0x1a0] ss:$16 sps:$4 sm:$0xff]   ;;  %v2453_v53 = vld [vmem:[%s3211_s15 + $0x1c4] ss:$16 sps:$4 sm:$0xff]   ;;  %v2473_v54 = vld [vmem:[%s3211_s15 + $0x168] ss:$16 sps:$4 sm:$0xff]  }
  0xb1   : > { %833 = vmatpush1.bf16.msra.mxu0 %v2401_v14  ;;  %946 = vmatpush1.bf16.msra.mxu1 %v2434_v25  ;;  %v2477_v55 = vld [vmem:[%s3211_s15 + $0x18c] ss:$16 sps:$4 sm:$0xff]   ;;  %v2455_v56 = vld [vmem:[%s3211_s15 + $0x1c0] ss:$16 sps:$4 sm:$0xff]   ;;  %v2459_v57 = vld [vmem:[%s3211_s15 + $0x1e4] ss:$16 sps:$4 sm:$0xff]  }
  0xb2   : > { %834 = vmatprep.subr.bf16.mxu0 %v2402_v16  ;;  %947 = vmatprep.subr.bf16.mxu1 %v2438_v26  ;;  %v2479_v58 = vld [vmem:[%s3211_s15 + $0x188] ss:$16 sps:$4 sm:$0xff]   ;;  %v2480_v59 = vld [vmem:[%s3211_s15 + $0x1ac] ss:$16 sps:$4 sm:$0xff]   ;;  %v2461_v60 = vld [vmem:[%s3211_s15 + $0x1e0] ss:$16 sps:$4 sm:$0xff]  }
  0xb3   : > { %v2482_v61 = vld [vmem:[%s3211_s15 + $0x1a8] ss:$16 sps:$4 sm:$0xff]   ;;  %v2509_v63 = vld [vmem:[%s3217_s29 + $0x4] ss:$8 sps:$4 sm:$0xff]   ;;  %v2474_v0 = vld [vmem:[%s3203_s14 + $0x14] ss:$8 sps:$4 sm:$0xff]  }
  0xb4   : > { %v2465_v62 = vld [vmem:[%s3203_s14] ss:$8 sps:$4 sm:$0xff]   ;;  %v2486_v1 = vld [vmem:[%s3211_s15 + $0x1cc] ss:$16 sps:$4 sm:$0xff]   ;;  %v2510_v6 = vld [vmem:[%s3217_s29 + $0x10] ss:$8 sps:$4 sm:$0xff]  }
  0xb5   : > { %835 = vmatpush1.bf16.msra.mxu0 %v2404_v19  ;;  %948 = vmatpush1.bf16.msra.mxu1 %v2440_v29  ;;  %v2507_v2 = vld [vmem:[%s3217_s29] ss:$8 sps:$4 sm:$0xff]   ;;  %v2512_v3 = vld [vmem:[%s3217_s29 + $0x14] ss:$8 sps:$4 sm:$0xff]   ;;  %v2515_v7 = vld [vmem:[%s3217_s29 + $0x24] ss:$8 sps:$4 sm:$0xff]  }
  0xb6   : > { %836 = vmatprep.subr.bf16.mxu0 %v2405_v20  ;;  %949 = vmatprep.subr.bf16.mxu1 %v2444_v30  ;;  %v2488_v4 = vld [vmem:[%s3211_s15 + $0x1c8] ss:$16 sps:$4 sm:$0xff]   ;;  %v2489_v5 = vld [vmem:[%s3211_s15 + $0x1ec] ss:$16 sps:$4 sm:$0xff]   ;;  %p2190_p6 = scmp.ne.s32.totalorder %s2883_s18, 3 }
  0xb7   : > { %v2491_v8 = vld [vmem:[%s3211_s15 + $0x1e8] ss:$16 sps:$4 sm:$0xff]   ;;  %v2483_v10 = vld [vmem:[%s3203_s14 + $0x24] ss:$8 sps:$4 sm:$0xff]   ;;  %v2518_v12 = vld [vmem:[%s3217_s29 + $0x34] ss:$8 sps:$4 sm:$0xff]  }
  0xb8   : > { %v2476_v9 = vld [vmem:[%s3203_s14 + $0x10] ss:$8 sps:$4 sm:$0xff]   ;;  %v2513_v11 = vld [vmem:[%s3217_s29 + $0x20] ss:$8 sps:$4 sm:$0xff]   ;;  %v2521_v14 = vld [vmem:[%s3217_s29 + $0x44] ss:$8 sps:$4 sm:$0xff]  }
  0xb9   : > { %837 = vmatpush1.bf16.msra.mxu0 %v2407_v23  ;;  %950 = vmatpush1.bf16.msra.mxu1 %v2446_v33  ;;  %v2516_v13 = vld [vmem:[%s3217_s29 + $0x30] ss:$8 sps:$4 sm:$0xff]   ;;  %v2485_v15 = vld [vmem:[%s3203_s14 + $0x20] ss:$8 sps:$4 sm:$0xff]   ;;  %v2492_v16 = vld [vmem:[%s3203_s14 + $0x34] ss:$8 sps:$4 sm:$0xff]  }
  0xba   : > { %838 = vmatprep.subr.bf16.mxu0 %v2411_v24  ;;  %951 = vmatprep.subr.bf16.mxu1 %v2450_v34  ;;  %v2519_v17 = vld [vmem:[%s3217_s29 + $0x40] ss:$8 sps:$4 sm:$0xff]   ;;  %v2524_v18 = vld [vmem:[%s3217_s29 + $0x54] ss:$8 sps:$4 sm:$0xff]   ;;  %v2522_v19 = vld [vmem:[%s3217_s29 + $0x50] ss:$8 sps:$4 sm:$0xff]  }
  0xbb   : > { %v2527_v20 = vld [vmem:[%s3217_s29 + $0x64] ss:$8 sps:$4 sm:$0xff]   ;;  %v2494_v21 = vld [vmem:[%s3203_s14 + $0x30] ss:$8 sps:$4 sm:$0xff]   ;;  %v2525_v23 = vld [vmem:[%s3217_s29 + $0x60] ss:$8 sps:$4 sm:$0xff]  }
  0xbc   : > { %v2495_v22 = vld [vmem:[%s3203_s14 + $0x44] ss:$8 sps:$4 sm:$0xff]   ;;  %v2497_v24 = vld [vmem:[%s3203_s14 + $0x40] ss:$8 sps:$4 sm:$0xff]   ;;  %v2498_v25 = vld [vmem:[%s3203_s14 + $0x54] ss:$8 sps:$4 sm:$0xff]  }
  0xbd   : > { %839 = vmatpush1.bf16.msra.mxu0 %v2413_v27  ;;  %952 = vmatpush1.bf16.msra.mxu1 %v2452_v38  ;;  %v2500_v26 = vld [vmem:[%s3203_s14 + $0x50] ss:$8 sps:$4 sm:$0xff]   ;;  %v2501_v27 = vld [vmem:[%s3203_s14 + $0x64] ss:$8 sps:$4 sm:$0xff]   ;;  %v2504_v29 = vld [vmem:[%s3203_s14 + $0x74] ss:$8 sps:$4 sm:$0xff]  }
  0xbe   : > { %840 = vmatprep.subr.bf16.mxu0 %v2417_v28  ;;  %953 = vmatprep.subr.bf16.mxu1 %v2456_v39  ;;  %v2503_v28 = vld [vmem:[%s3203_s14 + $0x60] ss:$8 sps:$4 sm:$0xff]   ;;  %v2506_v30 = vld [vmem:[%s3203_s14 + $0x70] ss:$8 sps:$4 sm:$0xff]   ;;  %v2533_v33 = vld [vmem:[%s3217_s29 + $0x84] ss:$8 sps:$4 sm:$0xff]  }
  0xbf   : > { %v2531_v34 = vld [vmem:[%s3217_s29 + $0x80] ss:$8 sps:$4 sm:$0xff]   ;;  %v2534_v36 = vld [vmem:[%s3217_s29 + $0x90] ss:$8 sps:$4 sm:$0xff]   ;;  %v2542_v39 = vld [vmem:[%s3217_s29 + $0xb4] ss:$8 sps:$4 sm:$0xff]  }
  0xc0   : > { %v2537_v38 = vld [vmem:[%s3217_s29 + $0xa0] ss:$8 sps:$4 sm:$0xff]  }
  0xc1   : > { %841 = vmatpush1.bf16.msra.mxu0 %v2419_v31  ;;  %954 = vmatpush1.bf16.msra.mxu1 %v2458_v42  ;;  %v2530_v31 = vld [vmem:[%s3217_s29 + $0x74] ss:$8 sps:$4 sm:$0xff]   ;;  %v2543_v42 = vld [vmem:[%s3217_s29 + $0xc0] ss:$8 sps:$4 sm:$0xff]  }
  0xc2   : > { %842 = vmatprep.subr.bf16.mxu0 %v2423_v32  ;;  %955 = vmatprep.subr.bf16.mxu1 %v2462_v43  ;;  %v2528_v32 = vld [vmem:[%s3217_s29 + $0x70] ss:$8 sps:$4 sm:$0xff]   ;;  %v2548_v43 = vld [vmem:[%s3217_s29 + $0xd4] ss:$8 sps:$4 sm:$0xff]  }
  0xc5   : > { %843 = vmatpush1.bf16.msra.mxu0 %v2425_v35  ;;  %956 = vmatpush1.bf16.msra.mxu1 %v2464_v46  ;;  %v2536_v35 = vld [vmem:[%s3217_s29 + $0x94] ss:$8 sps:$4 sm:$0xff]   ;;  %v2549_v46 = vld [vmem:[%s3217_s29 + $0xe0] ss:$8 sps:$4 sm:$0xff]  }
  0xc6   : > { %844 = vmatprep.subr.bf16.mxu0 %v2429_v37  ;;  %957 = vmatprep.subr.bf16.mxu1 %v2468_v47  ;;  %v2539_v37 = vld [vmem:[%s3217_s29 + $0xa4] ss:$8 sps:$4 sm:$0xff]   ;;  %v2554_v47 = vld [vmem:[%s3217_s29 + $0xf4] ss:$8 sps:$4 sm:$0xff]  }
  0xc9   : > { %845 = vmatpush1.bf16.msra.mxu0 %v2431_v40  ;;  %958 = vmatpush1.bf16.msra.mxu1 %v2470_v50  ;;  %v2540_v40 = vld [vmem:[%s3217_s29 + $0xb0] ss:$8 sps:$4 sm:$0xff]  }
  0xca   : > { %846 = vmatprep.subr.bf16.mxu0 %v2435_v41  ;;  %959 = vmatprep.subr.bf16.mxu1 %v2471_v51  ;;  %v2545_v41 = vld [vmem:[%s3217_s29 + $0xc4] ss:$8 sps:$4 sm:$0xff]  }
  0xcd   : > { %847 = vmatpush1.bf16.msra.mxu0 %v2437_v44  ;;  %960 = vmatpush1.bf16.msra.mxu1 %v2473_v54  ;;  %v2546_v44 = vld [vmem:[%s3217_s29 + $0xd0] ss:$8 sps:$4 sm:$0xff]  }
  0xce   : > { %848 = vmatprep.subr.bf16.mxu0 %v2441_v45  ;;  %961 = vmatprep.subr.bf16.mxu1 %v2477_v55  ;;  %v2551_v45 = vld [vmem:[%s3217_s29 + $0xe4] ss:$8 sps:$4 sm:$0xff]  }
  0xd1   : > { %849 = vmatpush1.bf16.msra.mxu0 %v2443_v48  ;;  %962 = vmatpush1.bf16.msra.mxu1 %v2479_v58  ;;  %v2552_v48 = vld [vmem:[%s3217_s29 + $0xf0] ss:$8 sps:$4 sm:$0xff]  }
  0xd2   : > { %850 = vmatprep.subr.bf16.mxu0 %v2447_v49  ;;  %963 = vmatprep.subr.bf16.mxu1 %v2480_v59 }
  0xd5   : > { %851 = vmatpush1.bf16.msra.mxu0 %v2449_v52  ;;  %964 = vmatpush1.bf16.msra.mxu1 %v2482_v61 }
  0xd6   : > { %852 = vmatprep.subr.bf16.mxu0 %v2453_v53  ;;  %965 = vmatprep.subr.bf16.mxu1 %v2486_v1 }
  0xd9   : > { %853 = vmatpush1.bf16.msra.mxu0 %v2455_v56  ;;  %966 = vmatpush1.bf16.msra.mxu1 %v2488_v4 }
  0xda   : > { %854 = vmatprep.subr.bf16.mxu0 %v2459_v57  ;;  %967 = vmatprep.subr.bf16.mxu1 %v2489_v5 }
  0xdd   : > { %855 = vmatpush1.bf16.msra.mxu0 %v2461_v60  ;;  %968 = vmatpush1.bf16.msra.mxu1 %v2491_v8 }
  0xde   : > { %1546 = vmatprep.subr.bf16.mxu0 %v2509_v63  ;;  %2236 = vmatprep.subr.bf16.mxu1 %v2509_v63 }
  0xe0   : > { %857 = vmatmul.mubr.bf16.vlgmr.msra.gmra.mrb[0].mxu0 %v2465_v62  ;;  %970 = vmatmul.mubr.bf16.vlgmr.msra.gmra.mrb[0].mxu1 %v2465_v62 }
  0xe1   : > { %866 = vmatprep.mubr.bf16.mxu0 %v2474_v0  ;;  %1547 = vmatpush1.bf16.msra.mxu0 %v2507_v2 }
  0xe2   : > { %1548 = vmatprep.subr.bf16.mxu0 %v2512_v3  ;;  %979 = vmatprep.mubr.bf16.mxu1 %v2474_v0 }
  0xe3   : > { %2252 = vmatpush1.bf16.msra.mxu1 %v2507_v2 }
  0xe4   : > { %2237 = vmatprep.subr.bf16.mxu1 %v2512_v3 }
  0xe5   : > { %1549 = vmatpush1.bf16.msra.mxu0 %v2510_v6 }
  0xe6   : > { %1550 = vmatprep.subr.bf16.mxu0 %v2515_v7 }
  0xe7   : > { %2253 = vmatpush1.bf16.msra.mxu1 %v2510_v6 }
  0xe8   : > { %867 = vmatmul.mubr.bf16.gmra.mrb[4].mxu0 %v2476_v9  ;;  %2238 = vmatprep.subr.bf16.mxu1 %v2515_v7 }
  0xe9   : > { %876 = vmatprep.mubr.bf16.mxu0 %v2483_v10  ;;  %1551 = vmatpush1.bf16.msra.mxu0 %v2513_v11 }
  0xea   : > { %1552 = vmatprep.subr.bf16.mxu0 %v2518_v12  ;;  %980 = vmatmul.mubr.bf16.gmra.mrb[4].mxu1 %v2476_v9 }
  0xeb   : > { %989 = vmatprep.mubr.bf16.mxu1 %v2483_v10  ;;  %2254 = vmatpush1.bf16.msra.mxu1 %v2513_v11 }
  0xec   : > { %2239 = vmatprep.subr.bf16.mxu1 %v2518_v12 }
  0xed   : > { %1553 = vmatpush1.bf16.msra.mxu0 %v2516_v13 }
  0xee   : > { %1554 = vmatprep.subr.bf16.mxu0 %v2521_v14 }
  0xef   : > { %2255 = vmatpush1.bf16.msra.mxu1 %v2516_v13 }
  0xf0   : > { %877 = vmatmul.mubr.bf16.gmra.mrb[8].mxu0 %v2485_v15  ;;  %2240 = vmatprep.subr.bf16.mxu1 %v2521_v14 }
  0xf1   : > { %886 = vmatprep.mubr.bf16.mxu0 %v2492_v16  ;;  %1555 = vmatpush1.bf16.msra.mxu0 %v2519_v17 }
  0xf2   : > { %1556 = vmatprep.subr.bf16.mxu0 %v2524_v18  ;;  %990 = vmatmul.mubr.bf16.gmra.mrb[8].mxu1 %v2485_v15 }
  0xf3   : > { %999 = vmatprep.mubr.bf16.mxu1 %v2492_v16  ;;  %2256 = vmatpush1.bf16.msra.mxu1 %v2519_v17 }
  0xf4   : > { %2241 = vmatprep.subr.bf16.mxu1 %v2524_v18 }
  0xf5   : > { %1557 = vmatpush1.bf16.msra.mxu0 %v2522_v19 }
  0xf6   : > { %1558 = vmatprep.subr.bf16.mxu0 %v2527_v20 }
  0xf7   : > { %2257 = vmatpush1.bf16.msra.mxu1 %v2522_v19 }
  0xf8   : > { %887 = vmatmul.mubr.bf16.gmra.mrb[12].mxu0 %v2494_v21  ;;  %2242 = vmatprep.subr.bf16.mxu1 %v2527_v20 }
  0xf9   : > { %896 = vmatprep.mubr.bf16.mxu0 %v2495_v22  ;;  %1559 = vmatpush1.bf16.msra.mxu0 %v2525_v23 }
  0xfa   : > { %1000 = vmatmul.mubr.bf16.gmra.mrb[12].mxu1 %v2494_v21  ;;  %1560 = vmatprep.subr.bf16.mxu0 %v2530_v31 }
  0xfb   : > { %1009 = vmatprep.mubr.bf16.mxu1 %v2495_v22  ;;  %2258 = vmatpush1.bf16.msra.mxu1 %v2525_v23 }
  0xfc   : > { %2243 = vmatprep.subr.bf16.mxu1 %v2530_v31 }
  0xfd   : > { %1561 = vmatpush1.bf16.msra.mxu0 %v2528_v32 }
  0xfe   : > { %1562 = vmatprep.subr.bf16.mxu0 %v2533_v33 }
  0xff   : > { %2259 = vmatpush1.bf16.msra.mxu1 %v2528_v32 }
 0x100   : > { %897 = vmatmul.mubr.bf16.gmra.mrb[16].mxu0 %v2497_v24  ;;  %2244 = vmatprep.subr.bf16.mxu1 %v2533_v33 }
 0x101   : > { %906 = vmatprep.mubr.bf16.mxu0 %v2498_v25  ;;  %1563 = vmatpush1.bf16.msra.mxu0 %v2531_v34 }
 0x102   : > { %1010 = vmatmul.mubr.bf16.gmra.mrb[16].mxu1 %v2497_v24  ;;  %1564 = vmatprep.subr.bf16.mxu0 %v2536_v35 }
 0x103   : > { %1019 = vmatprep.mubr.bf16.mxu1 %v2498_v25  ;;  %2260 = vmatpush1.bf16.msra.mxu1 %v2531_v34 }
 0x104   : > { %2245 = vmatprep.subr.bf16.mxu1 %v2536_v35 }
 0x105   : > { %1565 = vmatpush1.bf16.msra.mxu0 %v2534_v36 }
 0x106   : > { %1566 = vmatprep.subr.bf16.mxu0 %v2539_v37 }
 0x107   : > { %2261 = vmatpush1.bf16.msra.mxu1 %v2534_v36 }
 0x108   : > { %907 = vmatmul.mubr.bf16.gmra.mrb[20].mxu0 %v2500_v26  ;;  %2246 = vmatprep.subr.bf16.mxu1 %v2539_v37 }
 0x109   : > { %916 = vmatprep.mubr.bf16.mxu0 %v2501_v27  ;;  %1567 = vmatpush1.bf16.msra.mxu0 %v2537_v38 }
 0x10a   : > { %1020 = vmatmul.mubr.bf16.gmra.mrb[20].mxu1 %v2500_v26  ;;  %1568 = vmatprep.subr.bf16.mxu0 %v2542_v39 }
 0x10b   : > { %1029 = vmatprep.mubr.bf16.mxu1 %v2501_v27  ;;  %2262 = vmatpush1.bf16.msra.mxu1 %v2537_v38 }
 0x10c   : > { %2247 = vmatprep.subr.bf16.mxu1 %v2542_v39 }
 0x10d   : > { %1569 = vmatpush1.bf16.msra.mxu0 %v2540_v40 }
 0x10e   : > { %1570 = vmatprep.subr.bf16.mxu0 %v2545_v41 }
 0x10f   : > { %2263 = vmatpush1.bf16.msra.mxu1 %v2540_v40 }
 0x110   : > { %917 = vmatmul.mubr.bf16.gmra.mrb[24].mxu0 %v2503_v28  ;;  %2248 = vmatprep.subr.bf16.mxu1 %v2545_v41 }
 0x111   : > { %926 = vmatprep.mubr.bf16.mxu0 %v2504_v29  ;;  %1571 = vmatpush1.bf16.msra.mxu0 %v2543_v42 }
 0x112   : > { %1030 = vmatmul.mubr.bf16.gmra.mrb[24].mxu1 %v2503_v28  ;;  %1572 = vmatprep.subr.bf16.mxu0 %v2548_v43 }
 0x113   : > { %1039 = vmatprep.mubr.bf16.mxu1 %v2504_v29  ;;  %2264 = vmatpush1.bf16.msra.mxu1 %v2543_v42 }
 0x114   : > { %2249 = vmatprep.subr.bf16.mxu1 %v2548_v43 }
 0x115   : > { %1573 = vmatpush1.bf16.msra.mxu0 %v2546_v44 }
 0x116   : > { %1574 = vmatprep.subr.bf16.mxu0 %v2551_v45 }
 0x117   : > { %2265 = vmatpush1.bf16.msra.mxu1 %v2546_v44 }
 0x118   : > { %927 = vmatmul.mubr.bf16.gmra.mrb[28].mxu0 %v2506_v30  ;;  %2250 = vmatprep.subr.bf16.mxu1 %v2551_v45 }
 0x119   : > { %1575 = vmatpush1.bf16.msra.mxu0 %v2549_v46 }
 0x11a   : > { %1040 = vmatmul.mubr.bf16.gmra.mrb[28].mxu1 %v2506_v30  ;;  %1576 = vmatprep.subr.bf16.mxu0 %v2554_v47 }
 0x11b   : > { %2266 = vmatpush1.bf16.msra.mxu1 %v2549_v46 }
 0x11c   : > { %2251 = vmatprep.subr.bf16.mxu1 %v2554_v47 }
 0x11d   : > { %1577 = vmatpush1.bf16.msra.mxu0 %v2552_v48 }
 0x11f   : > { %2267 = vmatpush1.bf16.msra.mxu1 %v2552_v48 }
 0x1b3   : > { %v3334_v49 = vpop.f32.mrb[0].mxu0  ;;  %v3354_v62 = vpop.f32.mrb[0].mxu1 }
 0x1b4   : > { %v2126_v50 = vmul.f32 -1.442695, %v3334_v49  ;;  %v3337_v51 = vpop.f32.mrb[1].mxu0  ;;  %v3359_v1 = vpop.f32.mrb[1].mxu1 }
 0x1b5   : > { %v2127_v52 = vmul.f32 -1.442695, %v3337_v51  ;;  %v3340_v53 = vpop.f32.mrb[2].mxu0  ;;  %v3362_v3 = vpop.f32.mrb[2].mxu1 }
 0x1b6   : > { %2555 = vpow2.f32 %v2126_v50  ;;  %v2128_v54 = vmul.f32 -1.442695, %v3340_v53  ;;  %v3343_v55 = vpop.f32.mrb[3].mxu0  ;;  %v3364_v5 = vpop.f32.mrb[3].mxu1 }
 0x1b7   : > { %2557 = vpow2.f32 %v2127_v52  ;;  %v2129_v56 = vmul.f32 -1.442695, %v3343_v55 }
 0x1b8   : > { %2559 = vpow2.f32 %v2128_v54 }
 0x1b9   : > { %2561 = vpow2.f32 %v2129_v56 }
 0x1bb   : > { %v3346_v57 = vpop.f32.mrb[4].mxu0 }
 0x1bc   : > { %v2130_v58 = vmul.f32 -1.442695, %v3346_v57  ;;  %v3349_v59 = vpop.f32.mrb[5].mxu0 }
 0x1bd   : > { %v2131_v60 = vmul.f32 -1.442695, %v3349_v59  ;;  %v3352_v61 = vpop.f32.mrb[6].mxu0  ;;  %v3374_v18 = vpop.f32.mrb[4].mxu1 }
 0x1be   : > { %2563 = vpow2.f32 %v2130_v58  ;;  %v2132_v63 = vmul.f32 -1.442695, %v3352_v61  ;;  %v3357_v0 = vpop.f32.mrb[7].mxu0  ;;  %v3379_v21 = vpop.f32.mrb[5].mxu1 }
 0x1bf   : > { %2565 = vpow2.f32 %v2131_v60  ;;  %v2133_v2 = vmul.f32 -1.442695, %v3357_v0  ;;  %v3382_v23 = vpop.f32.mrb[6].mxu1 }
 0x1c0   : > { %v2556_v4 = vpop.eup %2555  ;;  %2567 = vpow2.f32 %v2132_v63  ;;  %v3384_v25 = vpop.f32.mrb[7].mxu1 }
 0x1c1   : > { %v2558_v6 = vpop.eup %2557  ;;  %v1146_v7 = vadd.f32 1.0, %v2556_v4  ;;  %2569 = vpow2.f32 %v2133_v2 }
 0x1c2   : > { %v2560_v8 = vpop.eup %2559  ;;  %v1147_v9 = vadd.f32 1.0, %v2558_v6 }
 0x1c3   : > { %v2562_v10 = vpop.eup %2561  ;;  %2571 = vrcp.f32 %v1146_v7  ;;  %v1148_v11 = vadd.f32 1.0, %v2560_v8  ;;  %v3366_v12 = vpop.f32.mrb[8].mxu0 }
 0x1c4   : > { %2573 = vrcp.f32 %v1147_v9  ;;  %v1149_v13 = vadd.f32 1.0, %v2562_v10  ;;  %v2134_v14 = vmul.f32 -1.442695, %v3366_v12  ;;  %v3369_v15 = vpop.f32.mrb[9].mxu0 }
 0x1c5   : > { %2575 = vrcp.f32 %v1148_v11  ;;  %v2135_v16 = vmul.f32 -1.442695, %v3369_v15  ;;  %v3372_v17 = vpop.f32.mrb[10].mxu0  ;;  %v3394_v39 = vpop.f32.mrb[8].mxu1 }
 0x1c6   : > { %2577 = vrcp.f32 %v1149_v13  ;;  %v2136_v19 = vmul.f32 -1.442695, %v3372_v17  ;;  %v3377_v20 = vpop.f32.mrb[11].mxu0  ;;  %v3400_v44 = vpop.f32.mrb[9].mxu1 }
 0x1c7   : > { %2579 = vpow2.f32 %v2134_v14  ;;  %v2137_v22 = vmul.f32 -1.442695, %v3377_v20  ;;  %v3404_v48 = vpop.f32.mrb[10].mxu1 }
 0x1c8   : > { %v2564_v24 = vpop.eup %2563  ;;  %2581 = vpow2.f32 %v2135_v16  ;;  %v3408_v54 = vpop.f32.mrb[11].mxu1 }
 0x1c9   : > { %v2566_v26 = vpop.eup %2565  ;;  %v1150_v27 = vadd.f32 1.0, %v2564_v24  ;;  %2583 = vpow2.f32 %v2136_v19 }
 0x1ca   : > { %v2568_v28 = vpop.eup %2567  ;;  %v1151_v29 = vadd.f32 1.0, %v2566_v26  ;;  %2585 = vpow2.f32 %v2137_v22 }
 0x1cb   : > { %v2570_v30 = vpop.eup %2569  ;;  %2587 = vrcp.f32 %v1150_v27  ;;  %v1152_v31 = vadd.f32 1.0, %v2568_v28  ;;  %v3386_v32 = vpop.f32.mrb[12].mxu0 }
 0x1cc   : > { %2589 = vrcp.f32 %v1151_v29  ;;  %v1153_v33 = vadd.f32 1.0, %v2570_v30  ;;  %v2138_v34 = vmul.f32 -1.442695, %v3386_v32  ;;  %v3389_v35 = vpop.f32.mrb[13].mxu0 }
 0x1cd   : > { %v2572_v36 = vpop.eup %2571  ;;  %2591 = vrcp.f32 %v1152_v31  ;;  %v2139_v37 = vmul.f32 -1.442695, %v3389_v35  ;;  %v3392_v38 = vpop.f32.mrb[14].mxu0 }
 0x1ce   : > { %v2574_v40 = vpop.eup %2573  ;;  %v1242_v41 = vmul.f32 %v2572_v36, %v3334_v49  ;;  %2593 = vrcp.f32 %v1153_v33  ;;  %v2140_v42 = vmul.f32 -1.442695, %v3392_v38  ;;  %v3398_v43 = vpop.f32.mrb[15].mxu0 }
 0x1cf   : > { %v2576_v45 = vpop.eup %2575  ;;  %v1243_v46 = vmul.f32 %v2574_v40, %v3337_v51  ;;  %2595 = vpow2.f32 %v2138_v34  ;;  %v2141_v47 = vmul.f32 -1.442695, %v3398_v43  ;;  %v3422_v16 = vpop.f32.mrb[12].mxu1 }
 0x1d0   : > { %v2578_v50 = vpop.eup %2577  ;;  %v1244_v52 = vmul.f32 %v2576_v45, %v3340_v53  ;;  %2597 = vpow2.f32 %v2139_v37  ;;  %v1274_v49 = vmul.f32 %v1242_v41, %v3354_v62  ;;  %v3428_v26 = vpop.f32.mrb[13].mxu1 }
 0x1d1   : > { %v2580_v56 = vpop.eup %2579  ;;  %v1245_v58 = vmul.f32 %v2578_v50, %v3343_v55  ;;  %2599 = vpow2.f32 %v2140_v42  ;;  %v1275_v60 = vmul.f32 %v1243_v46, %v3359_v1  ;;  %v3432_v30 = vpop.f32.mrb[14].mxu1 }
 0x1d2   : > { %v2582_v51 = vpop.eup %2581  ;;  %v1154_v63 = vadd.f32 1.0, %v2580_v56  ;;  %2601 = vpow2.f32 %v2141_v47  ;;  %v1276_v2 = vmul.f32 %v1244_v52, %v3362_v3  ;;  %v3436_v34 = vpop.f32.mrb[15].mxu1 }
 0x1d3   : > { %v2584_v4 = vpop.eup %2583  ;;  %v1155_v6 = vadd.f32 1.0, %v2582_v51  ;;  %v1277_v53 = vmul.f32 %v1245_v58, %v3364_v5  ;;  %v3414_v7 = vpop.f32.mrb[16].mxu0 }
 0x1d4   : > { %v2586_v62 = vpop.eup %2585  ;;  %2603 = vrcp.f32 %v1154_v63  ;;  %v1156_v8 = vadd.f32 1.0, %v2584_v4  ;;  %v1306_v9 = vpack.c.bf16 %v1276_v2, %v1274_v49  ;;  %v2142_v55 = vmul.f32 -1.442695, %v3414_v7  ;;  %v3417_v10 = vpop.f32.mrb[17].mxu0 }
 0x1d5   : > { %v2588_v1 = vpop.eup %2587  ;;  %2605 = vrcp.f32 %v1155_v6  ;;  %v1157_v11 = vadd.f32 1.0, %v2586_v62  ;;  %v1307_v13 = vpack.c.bf16 %v1277_v53, %v1275_v60  ;;  %v2143_v3 = vmul.f32 -1.442695, %v3417_v10  ;;  %v3420_v14 = vpop.f32.mrb[18].mxu0 }
 0x1d6   : > { %v2590_v5 = vpop.eup %2589  ;;  %v1246_v19 = vmul.f32 %v2588_v1, %v3346_v57  ;;  %2607 = vrcp.f32 %v1156_v8  ;;  %v2144_v22 = vmul.f32 -1.442695, %v3420_v14  ;;  %v3426_v24 = vpop.f32.mrb[19].mxu0 }
 0x1d7   : > { %v2592_v27 = vpop.eup %2591  ;;  %v1247_v28 = vmul.f32 %v2590_v5, %v3349_v59  ;;  %2609 = vrcp.f32 %v1157_v11  ;;  %v2145_v29 = vmul.f32 -1.442695, %v3426_v24  ;;  %1578 = vmatprep.mubr.bf16.mxu0 %v1307_v13  ;;  %v3450_v60 = vpop.f32.mrb[16].mxu1 }
 0x1d8   : > { %v2594_v31 = vpop.eup %2593  ;;  %v1248_v33 = vmul.f32 %v2592_v27, %v3352_v61  ;;  %2611 = vpow2.f32 %v2142_v55  ;;  %v1278_v57 = vmul.f32 %v1246_v19, %v3374_v18  ;;  %1579 = vmatmul.mubr.bf16.vlgmr.msra.gmra.mrb[32].mxu0 %v1306_v9  ;;  %v3455_v2 = vpop.f32.mrb[17].mxu1 }
 0x1d9   : > { %v2596_v36 = vpop.eup %2595  ;;  %v1249_v37 = vmul.f32 %v2594_v31, %v3357_v0  ;;  %2613 = vpow2.f32 %v2143_v3  ;;  %v1279_v59 = vmul.f32 %v1247_v28, %v3379_v21  ;;  %v3459_v62 = vpop.f32.mrb[18].mxu1 }
 0x1da   : > { %v2598_v40 = vpop.eup %2597  ;;  %v1158_v41 = vadd.f32 1.0, %v2596_v36  ;;  %2615 = vpow2.f32 %v2144_v22  ;;  %v1280_v42 = vmul.f32 %v1248_v33, %v3382_v23  ;;  %v3462_v55 = vpop.f32.mrb[19].mxu1 }
 0x1db   : > { %v2600_v45 = vpop.eup %2599  ;;  %v1159_v46 = vadd.f32 1.0, %v2598_v40  ;;  %2617 = vpow2.f32 %v2145_v29  ;;  %v1281_v61 = vmul.f32 %v1249_v37, %v3384_v25  ;;  %v3442_v18 = vpop.f32.mrb[20].mxu0 }
 0x1dc   : > { %v2602_v47 = vpop.eup %2601  ;;  %2619 = vrcp.f32 %v1158_v41  ;;  %v1160_v50 = vadd.f32 1.0, %v2600_v45  ;;  %v1308_v52 = vpack.c.bf16 %v1280_v42, %v1278_v57  ;;  %v2146_v0 = vmul.f32 -1.442695, %v3442_v18  ;;  %v3445_v49 = vpop.f32.mrb[21].mxu0 }
 0x1dd   : > { %2621 = vrcp.f32 %v1159_v46  ;;  %v1161_v21 = vadd.f32 1.0, %v2602_v47  ;;  %v1309_v56 = vpack.c.bf16 %v1281_v61, %v1279_v59  ;;  %v2147_v23 = vmul.f32 -1.442695, %v3445_v49  ;;  %v3448_v58 = vpop.f32.mrb[22].mxu0  ;;  %v3477_v36 = vpop.f32.mrb[20].mxu1 }
 0x1de   : > { %v2604_v25 = vpop.eup %2603  ;;  %2623 = vrcp.f32 %v1160_v50  ;;  %v2148_v51 = vmul.f32 -1.442695, %v3448_v58  ;;  %v3453_v63 = vpop.f32.mrb[23].mxu0 }
 0x1df   : > { %v2606_v4 = vpop.eup %2605  ;;  %v1250_v6 = vmul.f32 %v2604_v25, %v3366_v12  ;;  %2625 = vrcp.f32 %v1161_v21  ;;  %v2149_v53 = vmul.f32 -1.442695, %v3453_v63  ;;  %1588 = vmatprep.mubr.bf16.mxu0 %v1309_v56 }
 0x1e0   : > { %v2608_v8 = vpop.eup %2607  ;;  %v1251_v9 = vmul.f32 %v2606_v4, %v3369_v15  ;;  %2627 = vpow2.f32 %v2146_v0  ;;  %1589 = vmatmul.mubr.bf16.gmra.mrb[36].mxu0 %v1308_v52 }
 0x1e1   : > { %v2610_v1 = vpop.eup %2609  ;;  %v1252_v11 = vmul.f32 %v2608_v8, %v3372_v17  ;;  %2629 = vpow2.f32 %v2147_v23  ;;  %v1282_v13 = vmul.f32 %v1250_v6, %v3394_v39 }
 0x1e2   : > { %v2612_v12 = vpop.eup %2611  ;;  %v1253_v3 = vmul.f32 %v2610_v1, %v3377_v20  ;;  %2631 = vpow2.f32 %v2148_v51  ;;  %v1283_v5 = vmul.f32 %v1251_v9, %v3400_v44 }
 0x1e3   : > { %v2614_v19 = vpop.eup %2613  ;;  %v1162_v22 = vadd.f32 1.0, %v2612_v12  ;;  %2633 = vpow2.f32 %v2149_v53  ;;  %v1284_v15 = vmul.f32 %v1252_v11, %v3404_v48  ;;  %v3469_v27 = vpop.f32.mrb[24].mxu0 }
 0x1e4   : > { %v2616_v28 = vpop.eup %2615  ;;  %v1163_v29 = vadd.f32 1.0, %v2614_v19  ;;  %v1285_v17 = vmul.f32 %v1253_v3, %v3408_v54  ;;  %v3472_v31 = vpop.f32.mrb[25].mxu0  ;;  %v2150_v57 = vmul.f32 -1.442695, %v3469_v27 }
 0x1e5   : > { %v2618_v39 = vpop.eup %2617  ;;  %2635 = vrcp.f32 %v1162_v22  ;;  %v1164_v33 = vadd.f32 1.0, %v2616_v28  ;;  %v1310_v20 = vpack.c.bf16 %v1284_v15, %v1282_v13  ;;  %v3475_v44 = vpop.f32.mrb[26].mxu0  ;;  %v2151_v40 = vmul.f32 -1.442695, %v3472_v31 }
 0x1e6   : > { %v2620_v37 = vpop.eup %2619  ;;  %2637 = vrcp.f32 %v1163_v29  ;;  %v1165_v48 = vadd.f32 1.0, %v2618_v39  ;;  %v1311_v59 = vpack.c.bf16 %v1285_v17, %v1283_v5  ;;  %v3480_v41 = vpop.f32.mrb[27].mxu0  ;;  %v2152_v46 = vmul.f32 -1.442695, %v3475_v44 }
 0x1e7   : > { %v3482_v54 = vpop.f32.mrb[21].mxu1  ;;  %v2622_v42 = vpop.eup %2621  ;;  %v1254_v45 = vmul.f32 %v2620_v37, %v3386_v32  ;;  %2639 = vrcp.f32 %v1164_v33  ;;  %v2153_v52 = vmul.f32 -1.442695, %v3480_v41 }
 0x1e8   : > { %v3486_v61 = vpop.f32.mrb[22].mxu1  ;;  %v2624_v47 = vpop.eup %2623  ;;  %v1255_v50 = vmul.f32 %v2622_v42, %v3389_v35  ;;  %2641 = vrcp.f32 %v1165_v48  ;;  %1598 = vmatprep.mubr.bf16.mxu0 %v1311_v59 }
 0x1e9   : > { %v3490_v0 = vpop.f32.mrb[23].mxu1  ;;  %v2626_v21 = vpop.eup %2625  ;;  %v1256_v56 = vmul.f32 %v2624_v47, %v3392_v38  ;;  %2643 = vpow2.f32 %v2150_v57  ;;  %v1286_v32 = vmul.f32 %v1254_v45, %v3422_v16  ;;  %1599 = vmatmul.mubr.bf16.gmra.mrb[40].mxu0 %v1310_v20 }
 0x1ea   : > { %v2628_v23 = vpop.eup %2627  ;;  %v1257_v25 = vmul.f32 %v2626_v21, %v3398_v43  ;;  %2645 = vpow2.f32 %v2151_v40  ;;  %v1287_v51 = vmul.f32 %v1255_v50, %v3428_v26  ;;  %v3505_v12 = vpop.f32.mrb[24].mxu1 }
 0x1eb   : > { %v2630_v35 = vpop.eup %2629  ;;  %v1166_v4 = vadd.f32 1.0, %v2628_v23  ;;  %2647 = vpow2.f32 %v2152_v46  ;;  %v1288_v6 = vmul.f32 %v1256_v56, %v3432_v30  ;;  %v3497_v53 = vpop.f32.mrb[28].mxu0 }
 0x1ec   : > { %v2632_v8 = vpop.eup %2631  ;;  %v1167_v9 = vadd.f32 1.0, %v2630_v35  ;;  %2649 = vpow2.f32 %v2153_v52  ;;  %v1289_v38 = vmul.f32 %v1257_v25, %v3436_v34  ;;  %v3500_v16 = vpop.f32.mrb[29].mxu0  ;;  %v2154_v26 = vmul.f32 -1.442695, %v3497_v53 }
 0x1ed   : > { %v2634_v1 = vpop.eup %2633  ;;  %2651 = vrcp.f32 %v1166_v4  ;;  %v1168_v43 = vadd.f32 1.0, %v2632_v8  ;;  %v1312_v11 = vpack.c.bf16 %v1288_v6, %v1286_v32  ;;  %v3503_v13 = vpop.f32.mrb[30].mxu0  ;;  %v2155_v5 = vmul.f32 -1.442695, %v3500_v16 }
 0x1ee   : > { %2653 = vrcp.f32 %v1167_v9  ;;  %v1169_v30 = vadd.f32 1.0, %v2634_v1  ;;  %v1313_v3 = vpack.c.bf16 %v1289_v38, %v1287_v51  ;;  %v3508_v19 = vpop.f32.mrb[31].mxu0  ;;  %v3510_v34 = vpop.f32.mrb[25].mxu1  ;;  %v2156_v15 = vmul.f32 -1.442695, %v3503_v13 }
 0x1ef   : > { %v2636_v22 = vpop.eup %2635  ;;  %2655 = vrcp.f32 %v1168_v43  ;;  %v3513_v28 = vpop.f32.mrb[26].mxu1  ;;  %v2157_v39 = vmul.f32 -1.442695, %v3508_v19 }
 0x1f0   : > { %v2638_v29 = vpop.eup %2637  ;;  %v1258_v17 = vmul.f32 %v2636_v22, %v3414_v7  ;;  %2657 = vrcp.f32 %v1169_v30  ;;  %1608 = vmatprep.mubr.bf16.mxu0 %v1313_v3  ;;  %v3517_v33 = vpop.f32.mrb[27].mxu1 }
 0x1f1   : > { %v2640_v20 = vpop.eup %2639  ;;  %v1259_v57 = vmul.f32 %v2638_v29, %v3417_v10  ;;  %2659 = vpow2.f32 %v2154_v26  ;;  %1609 = vmatmul.mubr.bf16.gmra.mrb[44].mxu0 %v1312_v11  ;;  %v3526_v21 = vpop.f32.mrb[28].mxu1 }
 0x1f2   : > { %v2642_v37 = vpop.eup %2641  ;;  %v1260_v48 = vmul.f32 %v2640_v20, %v3420_v14  ;;  %2661 = vpow2.f32 %v2155_v5  ;;  %v1290_v59 = vmul.f32 %v1258_v17, %v3450_v60  ;;  %v3528_v32 = vpop.f32.mrb[29].mxu1 }
 0x1f3   : > { %v2644_v40 = vpop.eup %2643  ;;  %v1261_v7 = vmul.f32 %v2642_v37, %v3426_v24  ;;  %2663 = vpow2.f32 %v2156_v15  ;;  %v1291_v42 = vmul.f32 %v1259_v57, %v3455_v2  ;;  %v1045_v25 = vpop.f32.mrb[30].mxu1 }
 0x1f4   : > { %v2646_v45 = vpop.eup %2645  ;;  %v1170_v46 = vadd.f32 1.0, %v2644_v40  ;;  %2665 = vpow2.f32 %v2157_v39  ;;  %v1292_v47 = vmul.f32 %v1260_v48, %v3459_v62  ;;  %v1047_v35 = vpop.f32.mrb[31].mxu1 }
 0x1f5   : > { %v2648_v10 = vpop.eup %2647  ;;  %v1171_v50 = vadd.f32 1.0, %v2646_v45  ;;  %v1293_v52 = vmul.f32 %v1261_v7, %v3462_v55 }
 0x1f6   : > { %v2650_v14 = vpop.eup %2649  ;;  %2667 = vrcp.f32 %v1170_v46  ;;  %v1172_v60 = vadd.f32 1.0, %v2648_v10  ;;  %v1314_v56 = vpack.c.bf16 %v1292_v47, %v1290_v59 }
 0x1f7   : > { %v2652_v24 = vpop.eup %2651  ;;  %2669 = vrcp.f32 %v1171_v50  ;;  %v1173_v2 = vadd.f32 1.0, %v2650_v14  ;;  %v1315_v23 = vpack.c.bf16 %v1293_v52, %v1291_v42  ;;  %v1323_v52 = vld [vmem:[#allocation2 + $0x8] sm:$0xff]  ;;  %v1324_v14 = vld [vmem:[#allocation2 + $0x10] sm:$0xff] }
 0x1f8   : > { %v2654_v51 = vpop.eup %2653  ;;  %v1262_v62 = vmul.f32 %v2652_v24, %v3442_v18  ;;  %2671 = vrcp.f32 %v1172_v60 }
 0x1f9   : > { %v2656_v4 = vpop.eup %2655  ;;  %v1263_v55 = vmul.f32 %v2654_v51, %v3445_v49  ;;  %2673 = vrcp.f32 %v1173_v2  ;;  %1618 = vmatprep.mubr.bf16.mxu1 %v1315_v23  ;;  %v1326_v23 = vld [vmem:[#allocation2 + $0x20] sm:$0xff] }
 0x1fa   : > { %v2658_v6 = vpop.eup %2657  ;;  %v1264_v8 = vmul.f32 %v2656_v4, %v3448_v58  ;;  %v1294_v9 = vmul.f32 %v1262_v62, %v3477_v36  ;;  %1619 = vmatmul.mubr.bf16.vlgmr.msra.gmra.mrb[32].mxu1 %v1314_v56  ;;  %v1328_v62 = vld [vmem:[#allocation2 + $0x30] sm:$0xff] }
 0x1fb   : > { %v2660_v38 = vpop.eup %2659  ;;  %v1265_v1 = vmul.f32 %v2658_v6, %v3453_v63  ;;  %v1295_v43 = vmul.f32 %v1263_v55, %v3482_v54  ;;  %v1329_v55 = vld [vmem:[#allocation2 + $0x38] sm:$0xff] }
 0x1fc   : > { %v2662_v11 = vpop.eup %2661  ;;  %v1174_v18 = vadd.f32 1.0, %v2660_v38  ;;  %v1296_v26 = vmul.f32 %v1264_v8, %v3486_v61 }
 0x1fd   : > { %v2664_v30 = vpop.eup %2663  ;;  %v1175_v3 = vadd.f32 1.0, %v2662_v11  ;;  %v1297_v49 = vmul.f32 %v1265_v1, %v3490_v0  ;;  %v1331_v11 = vld [vmem:[#allocation2 + $0x48] sm:$0xff] }
 0x1fe   : > { %v2666_v5 = vpop.eup %2665  ;;  %2675 = vrcp.f32 %v1174_v18  ;;  %v1176_v22 = vadd.f32 1.0, %v2664_v30  ;;  %v1316_v58 = vpack.c.bf16 %v1296_v26, %v1294_v9  ;;  %v1332_v26 = vld [vmem:[#allocation2 + $0x50] sm:$0xff] }
 0x1ff   : > { %2677 = vrcp.f32 %v1175_v3  ;;  %v1177_v36 = vadd.f32 1.0, %v2666_v5  ;;  %v1317_v15 = vpack.c.bf16 %v1297_v49, %v1295_v43  ;;  %v1330_v43 = vld [vmem:[#allocation2 + $0x40] sm:$0xff]  ;;  %v1333_v49 = vld [vmem:[#allocation2 + $0x58] sm:$0xff] }
 0x200   : > { %v2668_v29 = vpop.eup %2667  ;;  %2679 = vrcp.f32 %v1176_v22 }
 0x201   : > { %v2670_v63 = vpop.eup %2669  ;;  %v1266_v54 = vmul.f32 %v2668_v29, %v3469_v27  ;;  %2681 = vrcp.f32 %v1177_v36  ;;  %1628 = vmatprep.mubr.bf16.mxu1 %v1317_v15  ;;  %v1334_v29 = vld [vmem:[#allocation2 + $0x60] sm:$0xff] }
 0x202   : > { %v2672_v17 = vpop.eup %2671  ;;  %v1267_v61 = vmul.f32 %v2670_v63, %v3472_v31  ;;  %1629 = vmatmul.mubr.bf16.gmra.mrb[36].mxu1 %v1316_v58  ;;  %v1335_v63 = vld [vmem:[#allocation2 + $0x68] sm:$0xff] }
 0x203   : > { %v2674_v39 = vpop.eup %2673  ;;  %v1268_v0 = vmul.f32 %v2672_v17, %v3475_v44  ;;  %v1298_v20 = vmul.f32 %v1266_v54, %v3505_v12  ;;  %v1336_v17 = vld [vmem:[#allocation2 + $0x70] sm:$0xff] }
 0x204   : > { %v1269_v57 = vmul.f32 %v2674_v39, %v3480_v41  ;;  %v1299_v37 = vmul.f32 %v1267_v61, %v3510_v34 }
 0x205   : > { %v1300_v48 = vmul.f32 %v1268_v0, %v3513_v28  ;;  %v1337_v0 = vld [vmem:[#allocation2 + $0x78] sm:$0xff] }
 0x206   : > { %v1301_v59 = vmul.f32 %v1269_v57, %v3517_v33 }
 0x207   : > { %v1318_v27 = vpack.c.bf16 %v1300_v48, %v1298_v20 }
 0x208   : > { %v2676_v40 = vpop.eup %2675  ;;  %v1319_v7 = vpack.c.bf16 %v1301_v59, %v1299_v37 }
 0x209   : > { %v2678_v42 = vpop.eup %2677  ;;  %v1270_v31 = vmul.f32 %v2676_v40, %v3497_v53  ;;  %v1322_v53 = vld [vmem:[#allocation2] sm:$0xff]  ;;  %v1339_v40 = vld [vmem:[#allocation2 + $0x88] sm:$0xff] }
 0x20a   : > { %v2680_v45 = vpop.eup %2679  ;;  %v1271_v46 = vmul.f32 %v2678_v42, %v3500_v16  ;;  %1638 = vmatprep.mubr.bf16.mxu1 %v1319_v7  ;;  %v1340_v42 = vld [vmem:[#allocation2 + $0x90] sm:$0xff] }
 0x20b   : > { %v2682_v44 = vpop.eup %2681  ;;  %v1272_v12 = vmul.f32 %v2680_v45, %v3503_v13  ;;  %v1302_v41 = vmul.f32 %v1270_v31, %v3526_v21  ;;  %1639 = vmatmul.mubr.bf16.gmra.mrb[40].mxu1 %v1318_v27  ;;  %v1325_v13 = vld [vmem:[#allocation2 + $0x18] sm:$0xff]  ;;  %v1338_v27 = vld [vmem:[#allocation2 + $0x80] sm:$0xff] }
 0x20c   : > { %v1273_v34 = vmul.f32 %v2682_v44, %v3508_v19  ;;  %v1303_v28 = vmul.f32 %v1271_v46, %v3528_v32  ;;  %v1341_v46 = vld [vmem:[#allocation2 + $0x98] sm:$0xff] }
 0x20d   : > { %v1304_v33 = vmul.f32 %v1272_v12, %v1045_v25  ;;  %v1327_v25 = vld [vmem:[#allocation2 + $0x28] sm:$0xff] }
 0x20e   : > { %v1305_v47 = vmul.f32 %v1273_v34, %v1047_v35 }
 0x20f   : > { %v1320_v10 = vpack.c.bf16 %v1304_v33, %v1302_v41  ;;  %v1342_v33 = vld [vmem:[#allocation2 + $0xa0] sm:$0xff] }
 0x210   : > { %v1321_v50 = vpack.c.bf16 %v1305_v47, %v1303_v28  ;;  %v1343_v47 = vld [vmem:[#allocation2 + $0xa8] sm:$0xff] }
 0x212   : > { %1648 = vmatprep.mubr.bf16.mxu1 %v1321_v50  ;;  %v1344_v50 = vld [vmem:[#allocation2 + $0xb0] sm:$0xff] }
 0x213   : > { %1649 = vmatmul.mubr.bf16.gmra.mrb[44].mxu1 %v1320_v10 }
 0x2ab   : > { %v1580_v16 = vpop.f32.mrb[32].mxu0 }
 0x2ac   : > { %v1659_v60 = vadd.f32 %v1580_v16, %v1322_v53  ;;  %v1582_v56 = vpop.f32.mrb[33].mxu0  ;;  %v1345_v16 = vld [vmem:[#allocation2 + $0xb8] sm:$0xff] }
 0x2ad   : > { %v1660_v24 = vadd.f32 %v1582_v56, %v1323_v52  ;;  %v1584_v21 = vpop.f32.mrb[34].mxu0 }
 0x2ae   : > { %1691 = vst [vmem:[#allocation2] sm:$0xff] %v1659_v60  ;;  %v1661_v2 = vadd.f32 %v1584_v21, %v1324_v14  ;;  %v1586_v19 = vpop.f32.mrb[35].mxu0  ;;  %v1346_v21 = vld [vmem:[#allocation2 + $0xc0] sm:$0xff] }
 0x2af   : > { %1692 = vst [vmem:[#allocation2 + $0x8] sm:$0xff] %v1660_v24  ;;  %v1662_v32 = vadd.f32 %v1586_v19, %v1325_v13 }
 0x2b0   : > { %1693 = vst [vmem:[#allocation2 + $0x10] sm:$0xff] %v1661_v2  ;;  %v1347_v2 = vld [vmem:[#allocation2 + $0xc8] sm:$0xff] }
 0x2b1   : > { %1694 = vst [vmem:[#allocation2 + $0x18] sm:$0xff] %v1662_v32  ;;  %v1348_v32 = vld [vmem:[#allocation2 + $0xd0] sm:$0xff] }
 0x2b3   : > { %v1590_v51 = vpop.f32.mrb[36].mxu0 }
 0x2b4   : > { %v1663_v35 = vadd.f32 %v1590_v51, %v1326_v23  ;;  %v1592_v4 = vpop.f32.mrb[37].mxu0  ;;  %v1349_v51 = vld [vmem:[#allocation2 + $0xd8] sm:$0xff] }
 0x2b5   : > { %v1664_v6 = vadd.f32 %v1592_v4, %v1327_v25  ;;  %v1594_v8 = vpop.f32.mrb[38].mxu0 }
 0x2b6   : > { %1695 = vst [vmem:[#allocation2 + $0x20] sm:$0xff] %v1663_v35  ;;  %v1665_v9 = vadd.f32 %v1594_v8, %v1328_v62  ;;  %v1596_v38 = vpop.f32.mrb[39].mxu0  ;;  %v1350_v8 = vld [vmem:[#allocation2 + $0xe0] sm:$0xff] }
 0x2b7   : > { %1696 = vst [vmem:[#allocation2 + $0x28] sm:$0xff] %v1664_v6  ;;  %v1666_v1 = vadd.f32 %v1596_v38, %v1329_v55 }
 0x2b8   : > { %1697 = vst [vmem:[#allocation2 + $0x30] sm:$0xff] %v1665_v9  ;;  %v1351_v9 = vld [vmem:[#allocation2 + $0xe8] sm:$0xff] }
 0x2b9   : > { %1698 = vst [vmem:[#allocation2 + $0x38] sm:$0xff] %v1666_v1  ;;  %v1352_v1 = vld [vmem:[#allocation2 + $0xf0] sm:$0xff] }
 0x2bc   : > { %v1600_v18 = vpop.f32.mrb[40].mxu0 }
 0x2bd   : > { %v1667_v30 = vadd.f32 %v1600_v18, %v1330_v43  ;;  %v1602_v3 = vpop.f32.mrb[41].mxu0  ;;  %v1353_v18 = vld [vmem:[#allocation2 + $0xf8] sm:$0xff] }
 0x2be   : > { %v1668_v5 = vadd.f32 %v1602_v3, %v1331_v11  ;;  %v1604_v22 = vpop.f32.mrb[42].mxu0 }
 0x2bf   : > { %1699 = vst [vmem:[#allocation2 + $0x40] sm:$0xff] %v1667_v30  ;;  %v1669_v58 = vadd.f32 %v1604_v22, %v1332_v26  ;;  %v1606_v36 = vpop.f32.mrb[43].mxu0  ;;  %v1727_v22 = vld [vmem:[#allocation2] sm:$0xff] (!%p2190_p6) }
 0x2c0   : > { %1700 = vst [vmem:[#allocation2 + $0x48] sm:$0xff] %v1668_v5  ;;  %v1670_v15 = vadd.f32 %v1606_v36, %v1333_v49  ;;  %v1729_v36 = vld [vmem:[#allocation2 + $0x10] sm:$0xff] (!%p2190_p6) }
 0x2c1   : > { %1701 = vst [vmem:[#allocation2 + $0x50] sm:$0xff] %v1669_v58  ;;  %v1728_v58 = vld [vmem:[#allocation2 + $0x8] sm:$0xff] (!%p2190_p6) }
 0x2c2   : > { %1702 = vst [vmem:[#allocation2 + $0x58] sm:$0xff] %v1670_v15  ;;  %v2218_v15 = vpack.c.bf16 (!%p2190_p6), %v1728_v58, %v1727_v22 }
 0x2c4   : > { %v1610_v54 = vpop.f32.mrb[44].mxu0  ;;  %1855 = vst [vmem:[%s3219_s21] sm:$0xff] (!%p2190_p6), %v2218_v15 }
 0x2c5   : > { %v1671_v61 = vadd.f32 %v1610_v54, %v1334_v29  ;;  %v1612_v39 = vpop.f32.mrb[45].mxu0  ;;  %v1730_v29 = vld [vmem:[#allocation2 + $0x18] sm:$0xff] (!%p2190_p6)  ;;  %v1732_v54 = vld [vmem:[#allocation2 + $0x28] sm:$0xff] (!%p2190_p6) }
 0x2c6   : > { %v1672_v20 = vadd.f32 %v1612_v39, %v1335_v63  ;;  %v1614_v57 = vpop.f32.mrb[46].mxu0  ;;  %v1731_v63 = vld [vmem:[#allocation2 + $0x20] sm:$0xff] (!%p2190_p6)  ;;  %v1733_v39 = vld [vmem:[#allocation2 + $0x30] sm:$0xff] (!%p2190_p6) }
 0x2c7   : > { %1703 = vst [vmem:[#allocation2 + $0x60] sm:$0xff] %v1671_v61  ;;  %v1673_v37 = vadd.f32 %v1614_v57, %v1336_v17  ;;  %v1616_v48 = vpop.f32.mrb[47].mxu0  ;;  %v2219_v17 = vpack.c.bf16 (!%p2190_p6), %v1730_v29, %v1729_v36  ;;  %v2220_v61 = vpack.c.bf16 (!%p2190_p6), %v1732_v54, %v1731_v63 }
 0x2c8   : > { %1704 = vst [vmem:[#allocation2 + $0x68] sm:$0xff] %v1672_v20  ;;  %v1674_v59 = vadd.f32 %v1616_v48, %v1337_v0  ;;  %v1734_v0 = vld [vmem:[#allocation2 + $0x38] sm:$0xff] (!%p2190_p6)  ;;  %v1735_v20 = vld [vmem:[#allocation2 + $0x40] sm:$0xff] (!%p2190_p6)  ;;  %v1737_v48 = vld [vmem:[#allocation2 + $0x50] sm:$0xff] (!%p2190_p6) }
 0x2c9   : > { %1705 = vst [vmem:[#allocation2 + $0x70] sm:$0xff] %v1673_v37  ;;  %v2221_v57 = vpack.c.bf16 (!%p2190_p6), %v1734_v0, %v1733_v39  ;;  %v1736_v37 = vld [vmem:[#allocation2 + $0x48] sm:$0xff] (!%p2190_p6)  ;;  %1856 = vst [vmem:[%s3219_s21 + $0x8] sm:$0xff] (!%p2190_p6), %v2219_v17 }
 0x2ca   : > { %1706 = vst [vmem:[#allocation2 + $0x78] sm:$0xff] %v1674_v59  ;;  %v1738_v59 = vld [vmem:[#allocation2 + $0x58] sm:$0xff] (!%p2190_p6)  ;;  %1857 = vst [vmem:[%s3219_s21 + $0x10] sm:$0xff] (!%p2190_p6), %v2220_v61 }
 0x2cb   : > { %1858 = vst [vmem:[%s3219_s21 + $0x18] sm:$0xff] (!%p2190_p6), %v2221_v57 }
 0x2cd   : > { %v1620_v7 = vpop.f32.mrb[32].mxu1 }
 0x2ce   : > { %v1675_v31 = vadd.f32 %v1620_v7, %v1338_v27  ;;  %v1622_v45 = vpop.f32.mrb[33].mxu1  ;;  %v2222_v27 = vpack.c.bf16 (!%p2190_p6), %v1736_v37, %v1735_v20  ;;  %v1739_v7 = vld [vmem:[#allocation2 + $0x60] sm:$0xff] (!%p2190_p6) }
 0x2cf   : > { %v1676_v44 = vadd.f32 %v1622_v45, %v1339_v40  ;;  %v1624_v12 = vpop.f32.mrb[34].mxu1  ;;  %v2223_v40 = vpack.c.bf16 (!%p2190_p6), %v1738_v59, %v1737_v48 }
 0x2d0   : > { %1707 = vst [vmem:[#allocation2 + $0x80] sm:$0xff] %v1675_v31  ;;  %v1677_v41 = vadd.f32 %v1624_v12, %v1340_v42  ;;  %v1626_v34 = vpop.f32.mrb[35].mxu1  ;;  %v1740_v42 = vld [vmem:[#allocation2 + $0x68] sm:$0xff] (!%p2190_p6)  ;;  %v1741_v31 = vld [vmem:[#allocation2 + $0x70] sm:$0xff] (!%p2190_p6)  ;;  %1859 = vst [vmem:[%s3219_s21 + $0x20] sm:$0xff] (!%p2190_p6), %v2222_v27 }
 0x2d1   : > { %1708 = vst [vmem:[#allocation2 + $0x88] sm:$0xff] %v1676_v44  ;;  %v1678_v28 = vadd.f32 %v1626_v34, %v1341_v46  ;;  %v2224_v45 = vpack.c.bf16 (!%p2190_p6), %v1740_v42, %v1739_v7  ;;  %v1742_v46 = vld [vmem:[#allocation2 + $0x78] sm:$0xff] (!%p2190_p6)  ;;  %1860 = vst [vmem:[%s3219_s21 + $0x28] sm:$0xff] (!%p2190_p6), %v2223_v40 }
 0x2d2   : > { %1709 = vst [vmem:[#allocation2 + $0x90] sm:$0xff] %v1677_v41  ;;  %v2225_v41 = vpack.c.bf16 (!%p2190_p6), %v1742_v46, %v1741_v31 }
 0x2d3   : > { %1710 = vst [vmem:[#allocation2 + $0x98] sm:$0xff] %v1678_v28  ;;  %1861 = vst [vmem:[%s3219_s21 + $0x30] sm:$0xff] (!%p2190_p6), %v2224_v45 }
 0x2d4   : > { %1862 = vst [vmem:[%s3219_s21 + $0x38] sm:$0xff] (!%p2190_p6), %v2225_v41 }
 0x2d5   : > { %v1630_v10 = vpop.f32.mrb[36].mxu1 }
 0x2d6   : > { %v1679_v53 = vadd.f32 %v1630_v10, %v1342_v33  ;;  %v1632_v52 = vpop.f32.mrb[37].mxu1 }
 0x2d7   : > { %v1680_v14 = vadd.f32 %v1632_v52, %v1343_v47  ;;  %v1634_v60 = vpop.f32.mrb[38].mxu1  ;;  %v1743_v44 = vld [vmem:[#allocation2 + $0x80] sm:$0xff] (!%p2190_p6) }
 0x2d8   : > { %1711 = vst [vmem:[#allocation2 + $0xa0] sm:$0xff] %v1679_v53  ;;  %v1681_v56 = vadd.f32 %v1634_v60, %v1344_v50  ;;  %v1636_v13 = vpop.f32.mrb[39].mxu1  ;;  %v1744_v12 = vld [vmem:[#allocation2 + $0x88] sm:$0xff] (!%p2190_p6) }
 0x2d9   : > { %1712 = vst [vmem:[#allocation2 + $0xa8] sm:$0xff] %v1680_v14  ;;  %v1682_v24 = vadd.f32 %v1636_v13, %v1345_v16  ;;  %v2226_v34 = vpack.c.bf16 (!%p2190_p6), %v1744_v12, %v1743_v44  ;;  %v1745_v28 = vld [vmem:[#allocation2 + $0x90] sm:$0xff] (!%p2190_p6) }
 0x2da   : > { %1713 = vst [vmem:[#allocation2 + $0xb0] sm:$0xff] %v1681_v56  ;;  %v1746_v33 = vld [vmem:[#allocation2 + $0x98] sm:$0xff] (!%p2190_p6) }
 0x2db   : > { %1714 = vst [vmem:[#allocation2 + $0xb8] sm:$0xff] %v1682_v24  ;;  %v2227_v10 = vpack.c.bf16 (!%p2190_p6), %v1746_v33, %v1745_v28  ;;  %1863 = vst [vmem:[%s3219_s21 + $0x40] sm:$0xff] (!%p2190_p6), %v2226_v34 }
 0x2dd   : > { %1864 = vst [vmem:[%s3219_s21 + $0x48] sm:$0xff] (!%p2190_p6), %v2227_v10 }
 0x2de   : > { %v1640_v19 = vpop.f32.mrb[40].mxu1 }
 0x2df   : > { %v1683_v23 = vadd.f32 %v1640_v19, %v1346_v21  ;;  %v1642_v25 = vpop.f32.mrb[41].mxu1  ;;  %v1747_v47 = vld [vmem:[#allocation2 + $0xa0] sm:$0xff] (!%p2190_p6) }
 0x2e0   : > { %v1684_v62 = vadd.f32 %v1642_v25, %v1347_v2  ;;  %v1644_v35 = vpop.f32.mrb[42].mxu1  ;;  %v1748_v50 = vld [vmem:[#allocation2 + $0xa8] sm:$0xff] (!%p2190_p6) }
 0x2e1   : > { %1715 = vst [vmem:[#allocation2 + $0xc0] sm:$0xff] %v1683_v23  ;;  %v1685_v4 = vadd.f32 %v1644_v35, %v1348_v32  ;;  %v1646_v55 = vpop.f32.mrb[43].mxu1  ;;  %v1749_v53 = vld [vmem:[#allocation2 + $0xb0] sm:$0xff] (!%p2190_p6)  ;;  %v2228_v16 = vpack.c.bf16 (!%p2190_p6), %v1748_v50, %v1747_v47 }
 0x2e2   : > { %1716 = vst [vmem:[#allocation2 + $0xc8] sm:$0xff] %v1684_v62  ;;  %v1686_v6 = vadd.f32 %v1646_v55, %v1349_v51  ;;  %v1750_v52 = vld [vmem:[#allocation2 + $0xb8] sm:$0xff] (!%p2190_p6) }
 0x2e3   : > { %1717 = vst [vmem:[#allocation2 + $0xd0] sm:$0xff] %v1685_v4  ;;  %v2229_v14 = vpack.c.bf16 (!%p2190_p6), %v1750_v52, %v1749_v53  ;;  %1865 = vst [vmem:[%s3219_s21 + $0x50] sm:$0xff] (!%p2190_p6), %v2228_v16 }
 0x2e4   : > { %1718 = vst [vmem:[#allocation2 + $0xd8] sm:$0xff] %v1686_v6 }
 0x2e5   : > { %1866 = vst [vmem:[%s3219_s21 + $0x58] sm:$0xff] (!%p2190_p6), %v2229_v14 }
 0x2e6   : > { %v1650_v38 = vpop.f32.mrb[44].mxu1  ;;  %1726 = sbr.rel (%p2190_p6) target bundleno = 759 (0x2f7), region = 52 }
 0x2e7   : > { %v1687_v43 = vadd.f32 %v1650_v38, %v1350_v8  ;;  %v1652_v11 = vpop.f32.mrb[45].mxu1 }
 0x2e8   : > { %v1688_v26 = vadd.f32 %v1652_v11, %v1351_v9  ;;  %v1654_v30 = vpop.f32.mrb[46].mxu1  ;;  %v1751_v60 = vld [vmem:[#allocation2 + $0xc0] sm:$0xff] (!%p2190_p6) }
 0x2e9   : > { %1719 = vst [vmem:[#allocation2 + $0xe0] sm:$0xff] %v1687_v43  ;;  %v1689_v3 = vadd.f32 %v1654_v30, %v1352_v1  ;;  %v1656_v49 = vpop.f32.mrb[47].mxu1  ;;  %v1752_v56 = vld [vmem:[#allocation2 + $0xc8] sm:$0xff] (!%p2190_p6) }
 0x2ea   : > { %1720 = vst [vmem:[#allocation2 + $0xe8] sm:$0xff] %v1688_v26  ;;  %v1690_v5 = vadd.f32 %v1656_v49, %v1353_v18  ;;  %v1753_v13 = vld [vmem:[#allocation2 + $0xd0] sm:$0xff] (!%p2190_p6)  ;;  %v2230_v24 = vpack.c.bf16 (!%p2190_p6), %v1752_v56, %v1751_v60 }
 0x2eb   : > { %1721 = vst [vmem:[#allocation2 + $0xf0] sm:$0xff] %v1689_v3  ;;  %v1754_v21 = vld [vmem:[#allocation2 + $0xd8] sm:$0xff] (!%p2190_p6) }
 0x2ec   : > { %1722 = vst [vmem:[#allocation2 + $0xf8] sm:$0xff] %v1690_v5  ;;  %v2231_v32 = vpack.c.bf16 (!%p2190_p6), %v1754_v21, %v1753_v13  ;;  %1867 = vst [vmem:[%s3219_s21 + $0x60] sm:$0xff] (!%p2190_p6), %v2230_v24 }
 0x2ee   : > { %1868 = vst [vmem:[%s3219_s21 + $0x68] sm:$0xff] %v2231_v32 }
 0x2f0   : > { %v1755_v2 = vld [vmem:[#allocation2 + $0xe0] sm:$0xff] }
 0x2f1   : > { %v1756_v19 = vld [vmem:[#allocation2 + $0xe8] sm:$0xff] }
 0x2f2   : > { %v2232_v23 = vpack.c.bf16 %v1756_v19, %v1755_v2  ;;  %v1757_v25 = vld [vmem:[#allocation2 + $0xf0] sm:$0xff] }
 0x2f3   : > { %v1758_v51 = vld [vmem:[#allocation2 + $0xf8] sm:$0xff] }
 0x2f4   : > { %v2233_v62 = vpack.c.bf16 %v1758_v51, %v1757_v25  ;;  %1869 = vst [vmem:[%s3219_s21 + $0x70] sm:$0xff] %v2232_v23 }
 0x2f6   : > { %1870 = vst [vmem:[%s3219_s21 + $0x78] sm:$0xff] %v2233_v62 }
 0x2f7 PF: > { %s2235_s18 = sshll.u32 %s2887_s19, 11  ;;  %s3682_s11 = sld [smem:[#allocation20_spill]] }
 0x2f8   : > { %s1888_s4 = sshll.u32 %s3219_s21, 4  ;;  %s1872_s6 = scalar_lea.sflag [#allocation5], %s3199_s9  ;;  %s3576_s4 = int_to_ptr.vmem [resolvable:$true] %s1888_s4 }
 0x2f9   : > { %s2773_s26 = scalar_lea.vmem %s3576_s4, 2048  ;;  %p3683_p3 = scmp.ne.s32.totalorder %s3673_s25, 0 }
 0x2fa   : > { %p2774_p4 = scmp.ne.s32.totalorder %s3576_s4, %s2773_s26  ;;  %s2909_s3 = smov [#allocation9]  }
 0x2fb   : > { %s2777_s5 = sshll.u32 %s2909_s3, 4  ;;  %s2778_s5 = int_to_ptr.vmem [resolvable:$false] %s2777_s5 }
 0x2fc   : > { %p2775_p2 = pnand %p2774_p4, %p3683_p3  ;;  %s2779_s19 = scalar_lea.vmem %s2778_s5, 4096 }
 0x2fd   : > { %s3573_s24 = scalar_lea.hbm %s3682_s11, %s2235_s18  ;;  %p2780_p7 = scmp.lt.s32.totalorder %s3576_s4, %s2778_s5 }
 0x2fe   : > { %p2776_p11 = pneg %p2775_p2  ;;  %p2781_p5 = scmp.lt.s32.totalorder %s2779_s19, %s2773_s26 }
 0x300   : > { %p2782_p0 = por %p2781_p5, %p2780_p7 }
 0x302   : > { %p2783_p13 = pnand %p2782_p0, %p2776_p11 }
 0x304   : > { %2786 = shalt.err (!%p2783_p13)
}
 0x305   : > { %s2787_s14 = scalar_lea.hbm %s3573_s24, 2048  ;;  %s2791_s10 = scalar_lea.hbm %s3682_s11, 4096 }
 0x306   : > { %p2788_p10 = scmp.ne.s32.totalorder %s3573_s24, %s2787_s14  ;;  %p2792_p9 = scmp.lt.u32.totalorder %s3573_s24, %s3682_s11 }
 0x307   : > { %p2793_p8 = scmp.lt.u32.totalorder %s2791_s10, %s2787_s14  ;;  %p2795_p4 = scmp.lt.u32.totalorder %s2787_s14, %s3573_s24 }
 0x308   : > { %p2789_p12 = pnand %p2788_p10, %p3683_p3 }
 0x309   : > { %p2794_p6 = por %p2793_p8, %p2792_p9 }
 0x30a   : > { %p2790_p1 = pneg %p2789_p12 }
 0x30b   : > { %p2796_p2 = por %p2795_p4, %p2794_p6 }
 0x30d   : > { %p2797_p11 = pnand %p2796_p2, %p2790_p1 }
 0x30f   : > { %2800 = shalt.err (!%p2797_p11)
}
 0x310   : > { %s2910_s8 = smov 128   ;;  %s2911_s29 = smov 8  }
 0x311   : > { %2274 = dma.vmem_to_hbm [thread:$0]  (%p3683_p3), %s3576_s4, 2048, %s3573_s24, %s1872_s6, %s2910_s8, %s2910_s8, %s2911_s29  }
 0x312 PF: > { %s3684_s21 = sld [smem:[#allocation14_spill]]  ;;  %p2291_p7 = scmp.ge.s32.totalorder %s2899_s22, 2 }
 0x313   : > { %p3685_p5 = scmp.ne.s32.totalorder %s3674_s7, 0 }
 0x315   : > { %p2287_p0 = pnand %p2291_p7, %p3685_p5 }
 0x318   : > { %s1903_s18 = sand.u32 1, %s3684_s21  }
 0x319   : > { %s1904_s23 = scalar_lea.sflag [#allocation5], %s1903_s18 }
 0x31a   : > { %2854 = dma.done.wait (!%p2287_p0), %s1904_s23, 2048  }
 0x31b   : > { %2856 = vsyncadd (!%p2287_p0), %s1904_s23, 4294965248  ;;  %s22_s22 = sadd.s32 1, %s2899_s22   ;;  %s3686_s28 = sld [smem:[#allocation13_spill]] }
 0x31c   : > { %p19_p13 = scmp.ge.s32.totalorder %s22_s22, 10   ;;  %s3687_s14 = sld [smem:[#allocation17_spill]] }
 0x31d   : > { %s3688_s19 = sld [smem:[#allocation15_spill]]  ;;  %s3689_s25 = sld [smem:[#allocation16_spill]] }
 0x31e   : > { %s3690_s21 = sld [smem:[#allocation18_spill]]  ;;  %s3691_s12 = smov %s2863_s13 }
 0x31f   : > { %s3693_s15 = smov %s2875_s16  ;;  %s3694_s16 = smov %s2879_s17 }
 0x320   : > { %s3695_s17 = smov %s3109_s1  ;;  %s3696_s18 = smov %s2891_s20 }
 0x321   : > { %s3692_s13 = smov %s3686_s28  ;;  %21 = sbr.rel (!%p19_p13) target bundleno = 14 (0xe), region = 109 }
 0x323   : > { %s3697_s20 = smov %s3689_s25 }
 0x328   :  { %1909 = vsyncpa [#allocation4], 1 }
 0x329   :  { %1911 = vsyncpa [#allocation4 + $0x1], 1 }
 0x32a   :  { %1912 = vsyncpa [#allocation7], 1 }
 0x32b   :  { %1914 = vsyncpa [#allocation7 + $0x1], 1 }
 0x32c   :  { %1915 = vsyncpa [#allocation5], 1 }
 0x32d   :  { %1917 = vsyncpa [#allocation5 + $0x1], 1 }

</bundles_post_ra>
